<compile_context>
chip_gen: v7x
topology: tpu7x:2x2x1
jax: 0.10.0
libtpu: 0.0.40
codegen_flags: <defaults>
</compile_context>

<pallas_src>
import functools

import numpy as np
import jax
import jax.numpy as jnp
from jax.experimental import pallas as pl
from jax.experimental.pallas import tpu as pltpu


# ----------------------------------------------------------------------------- helpers (host glue)

def _dft_mats(n):
    """Forward DFT matrix split into real/imag parts (float32).

    F = Fr + i*Fi (symmetric).  The inverse transform is conj(F)/n, so the
    kernels use (Fr, -Fi) and the 1/n^2 of ifft2 is folded into the filters.
    """
    k = np.arange(n, dtype=np.float64)
    ang = 2.0 * np.pi * np.outer(k, k) / n
    Fr = np.cos(ang).astype(np.float32)
    Fi = (-np.sin(ang)).astype(np.float32)
    return Fr, Fi


def _sym_pad(img, pad_rc, direction="both"):
    """MATLAB padarray('symmetric') on a batch (B, R, C) via flip+concat slices.

    Equivalent to the module's _symmetric_pad for pad <= dim size (always true
    for the GIST configs used here); avoids the expensive 2-D XLA gather.
    """
    def pad_axis(a, pad, axis):
        if pad == 0:
            return a
        size = a.shape[axis]
        assert 0 < pad <= size, "symmetric pad larger than the dimension"
        idx_front = [slice(None)] * a.ndim
        idx_front[axis] = slice(0, pad)
        idx_back = [slice(None)] * a.ndim
        idx_back[axis] = slice(size - pad, size)
        front = jnp.flip(a[tuple(idx_front)], axis=axis)
        back = jnp.flip(a[tuple(idx_back)], axis=axis)
        if direction == "both":
            return jnp.concatenate([front, a, back], axis=axis)
        if direction == "post":
            return jnp.concatenate([a, back], axis=axis)
        return jnp.concatenate([front, a], axis=axis)      # 'pre'

    out = pad_axis(img, pad_rc[0], 1)
    out = pad_axis(out, pad_rc[1], 2)
    return out


def _create_gabor(orientations_per_scale, image_size):
    """Deterministic Gabor bank, mirrors GIST._create_gabor. Returns (n_filters, N, N)."""
    num_scales = len(orientations_per_scale)
    num_filters = sum(orientations_per_scale)
    params = []
    for i in range(num_scales):
        for j in range(orientations_per_scale[i]):
            params.append([0.35,
                           0.3 / 1.85 ** i,
                           16.0 * orientations_per_scale[i] ** 2 / 32 ** 2,
                           np.pi / orientations_per_scale[i] * j])
    params = np.array(params, dtype=np.float64)
    H, W = image_size
    assert H == W, "square padded images assumed"
    n = H
    rng = np.arange(-(n // 2), n // 2, dtype=np.float64)
    fy = np.broadcast_to(rng[:, None], (n, n))
    fx = np.broadcast_to(rng[None, :], (n, n))
    fr = np.fft.fftshift(np.sqrt(fx ** 2 + fy ** 2))
    t = np.fft.fftshift(np.angle(fx + 1j * fy))
    gabors = np.zeros((num_filters, n, n), dtype=np.float32)
    for i in range(num_filters):
        tr = t + params[i, 3]
        tr = tr + 2 * np.pi * (tr < -np.pi) - 2 * np.pi * (tr > np.pi)
        gabors[i] = np.exp(-10.0 * params[i, 0] * (fr / n / params[i, 1] - 1.0) ** 2
                           - 2.0 * params[i, 2] * np.pi * tr ** 2).astype(np.float32)
    return gabors


# ----------------------------------------------------------------------------- Pallas kernels

def _prefilt_kernel(img_ref, gf_ref, fr_ref, fi_ref, out_ref, *, w, out_h, out_w):
    """Whitening prefilter on one symmetric-padded image.

    Pass 1 (f32): out = x - lowpass(x).real  (cancellation-sensitive).
    Pass 2 (bf16 MXU operands / f32 acc): localstd = sqrt(|ifft2(fft2(out^2)*gf)|),
    which only feeds the benign denominator 0.2 + localstd.
    The output is cropped to the valid (out_h, out_w) window in-kernel.
    """
    f32, bf16 = jnp.float32, jnp.bfloat16
    x = jnp.log(img_ref[0] + 1.0)
    gf = gf_ref[...]                      # Gaussian low-pass, already scaled by 1/n^2
    Fr = fr_ref[...]
    Fi = fi_ref[...]

    def dot(a, b):
        return jnp.dot(a, b, preferred_element_type=f32)

    # -------- pass 1 (f32): fft2(x), filtered ifft2 (real part only) --------
    tr, ti = dot(Fr, x), dot(Fi, x)
    yr = dot(tr, Fr) - dot(ti, Fi)
    yi = dot(tr, Fi) + dot(ti, Fr)
    wr, wi = yr * gf, yi * gf
    ur = dot(Fr, wr) + dot(Fi, wi)        # conj(F) = Fr - i*Fi, 1/n^2 folded in gf
    ui = dot(Fr, wi) - dot(Fi, wr)
    low_r = dot(ur, Fr) + dot(ui, Fi)
    out = x - low_r

    # -------- pass 2 (bf16 operands): localstd --------
    Frb, Fib = Fr.astype(bf16), Fi.astype(bf16)
    sq = (out * out).astype(bf16)
    t2r, t2i = dot(Frb, sq), dot(Fib, sq)
    t2rb, t2ib = t2r.astype(bf16), t2i.astype(bf16)
    y2r = dot(t2rb, Frb) - dot(t2ib, Fib)
    y2i = dot(t2rb, Fib) + dot(t2ib, Frb)
    w2r = (y2r * gf).astype(bf16)
    w2i = (y2i * gf).astype(bf16)
    u2r = dot(Frb, w2r) + dot(Fib, w2i)
    u2i = dot(Frb, w2i) - dot(Fib, w2r)
    u2rb, u2ib = u2r.astype(bf16), u2i.astype(bf16)
    l2r = dot(u2rb, Frb) + dot(u2ib, Fib)
    l2i = dot(u2ib, Frb) - dot(u2rb, Fib)
    localstd = jnp.sqrt(jnp.sqrt(l2r * l2r + l2i * l2i))   # sqrt(abs(complex))

    res = out / (0.2 + localstd)
    # in-kernel crop to the valid window; lane-dense (out_w-wide) store
    out_ref[0] = res[w:w + out_h, w:w + out_w]


def _gabor_kernel(img_ref, gab_ref, fr_ref, fi_ref, frr_ref, fir_ref,
                  frc_ref, fic_ref, a_ref, at_ref, out_ref, yr_ref, yi_ref,
                  *, gf_blk):
    """One (image, filter-block) grid step: reuse the image spectrum, cropped
    ifft2 per filter (bf16 operands / f32 acc), magnitude, block-mean pooling."""
    fb = pl.program_id(1)
    f32, bf16 = jnp.float32, jnp.bfloat16

    def dot(a, b):
        return jnp.dot(a, b, preferred_element_type=f32)

    # fft2 of the prefiltered image: computed once per image (fb == 0) and kept
    # resident in VMEM scratch for all filter blocks (img block index and the
    # scratch don't change across the "arbitrary" filter-block axis).
    @pl.when(fb == 0)
    def _():
        Fr, Fi = fr_ref[...], fi_ref[...]
        x = img_ref[0].astype(bf16)
        tr, ti = dot(Fr, x), dot(Fi, x)
        trb, tib = tr.astype(bf16), ti.astype(bf16)
        yr_ref[...] = dot(trb, Fr) - dot(tib, Fi)
        yi_ref[...] = dot(trb, Fi) + dot(tib, Fr)

    Frr, Fir = frr_ref[...], fir_ref[...]   # (H, N) row-cropped conj-DFT (bf16)
    Frc, Fic = frc_ref[...], fic_ref[...]   # (N, W) col-cropped conj-DFT (bf16)
    A, At = a_ref[...], at_ref[...]         # block-mean pooling matrices (f32)
    yr, yi = yr_ref[...], yi_ref[...]

    # gf_blk is small (<= 4); fully unrolled, static indices.
    for g in range(gf_blk):
        gab = gab_ref[g]                    # bf16 gabor filter, 1/N^2 folded in
        wr = (yr * gab).astype(bf16)
        wi = (yi * gab).astype(bf16)
        # cropped ifft2: only rows/cols [be, be+H) are ever pooled downstream
        ur = dot(Frr, wr) + dot(Fir, wi)    # (H, N)
        ui = dot(Frr, wi) - dot(Fir, wr)
        urb, uib = ur.astype(bf16), ui.astype(bf16)
        vr = dot(urb, Frc) + dot(uib, Fic)  # (H, W)
        vi = dot(uib, Frc) - dot(urb, Fic)
        mag = jnp.sqrt(vr * vr + vi * vi)
        pooled = dot(dot(A, mag), At)       # (nbp, nbp) block means
        # per-image output slab stays resident across the filter-block axis;
        # one HBM writeback per image
        out_ref[0, pl.ds(fb * gf_blk + g, 1)] = pooled[None]


# ----------------------------------------------------------------------------- module

class GISTPallas:
    def __init__(self, orientations_per_scale=(8, 8, 8, 8), num_blocks=4,
                 fc_prefilt=4, image_size=(256, 256), boundary_extension=32):
        self.ops = tuple(orientations_per_scale)
        self.num_blocks = num_blocks
        self.fc_prefilt = fc_prefilt
        self.image_size = tuple(image_size)
        self.be = boundary_extension
        H, W = self.image_size
        assert H == W, "square images assumed"
        assert H % num_blocks == 0, "uniform down_n blocks assumed"
        assert boundary_extension <= H, "flip-based symmetric pad assumes pad <= size"
        self.n_filters = sum(self.ops)
        self.n_features = self.n_filters * num_blocks ** 2

        # filter-block factor for the gabor grid (amortizes per-step overhead)
        self.gf_blk = next(g for g in (4, 2, 1) if self.n_filters % g == 0)

        # ---- prefilter constants ----
        w = 5
        self.w = w
        sn, sm = H + 2 * w, W + 2 * w
        n = max(sn, sm)
        n += n % 2
        self.sn, self.sm, self.n_pre = sn, sm, n
        s1 = fc_prefilt / np.sqrt(np.log(2.0))
        rng = np.arange(-(n // 2), n // 2, dtype=np.float64)
        fy = np.broadcast_to(rng[:, None], (n, n))
        fx = np.broadcast_to(rng[None, :], (n, n))
        gf = np.fft.fftshift(np.exp(-(fx ** 2 + fy ** 2) / s1 ** 2)) / (n * n)
        self.gf_pre = jnp.asarray(gf.astype(np.float32))        # 1/n^2 folded in
        Fr_p, Fi_p = _dft_mats(n)
        self.Fr_pre = jnp.asarray(Fr_p)                          # f32 (pass 1 stays f32)
        self.Fi_pre = jnp.asarray(Fi_p)

        # ---- gabor constants ----
        be = boundary_extension
        N = H + 2 * be
        self.N = N
        gab = _create_gabor(self.ops, (N, N)) / np.float32(N * N)    # 1/N^2 folded in
        self.gabors = jnp.asarray(gab).astype(jnp.bfloat16)          # (nf, N, N) bf16 stream
        Fr_g, Fi_g = _dft_mats(N)
        bf16 = jnp.bfloat16
        self.Fr_gab = jnp.asarray(Fr_g).astype(bf16)                 # full (N, N), fft2 only
        self.Fi_gab = jnp.asarray(Fi_g).astype(bf16)
        # pre-sliced conj-DFT crops for the cropped ifft2 stage
        self.Frr = jnp.asarray(Fr_g[be:be + H, :]).astype(bf16)      # (H, N)
        self.Fir = jnp.asarray(Fi_g[be:be + H, :]).astype(bf16)
        self.Frc = jnp.asarray(Fr_g[:, be:be + W]).astype(bf16)      # (N, W)
        self.Fic = jnp.asarray(Fi_g[:, be:be + W]).astype(bf16)

        # block-mean matrix over the CROPPED (H, W) window (padded to >=8 rows)
        blk = H // num_blocks
        self.nb_pad = max(8, num_blocks)
        A = np.zeros((self.nb_pad, H), dtype=np.float32)
        for i in range(num_blocks):
            A[i, i * blk: (i + 1) * blk] = 1.0 / blk
        self.A = jnp.asarray(A)
        self.At = jnp.asarray(np.ascontiguousarray(A.T))

    def __call__(self, x):
        if x.ndim == 3:  # single image (C, H, W) -> same math, flat output
            return self.__call__(x[None])[0]
        B, C, H, W = x.shape
        assert (H, W) == self.image_size

        # grayscale + per-image [0, 255] normalization (glue).  Epsilon guard so a
        # constant image doesn't produce NaN (reference would divide by zero).
        img = jnp.mean(x, axis=1)
        img = img - jnp.min(img, axis=(1, 2), keepdims=True)
        mx = jnp.max(img, axis=(1, 2), keepdims=True)
        img = img * (255.0 / jnp.maximum(mx, 1e-12))

        # ----------------- prefilter (log + crop folded into the kernel) -----------------
        w, sn, sm, n = self.w, self.sn, self.sm, self.n_pre
        padded = _sym_pad(img, (w, w), "both")
        padded = _sym_pad(padded, (n - sn, n - sm), "post")      # (B, n, n)
        pre_cost = pl.CostEstimate(
            flops=int(B * 52 * n ** 3),
            transcendentals=int(B * 3 * n * n),
            bytes_accessed=int(B * (4 * n * n + 4 * H * W) + 3 * 4 * n * n))
        pre = pl.pallas_call(
            functools.partial(_prefilt_kernel, w=w, out_h=H, out_w=W),
            out_shape=jax.ShapeDtypeStruct((B, H, W), jnp.float32),
            grid=(B,),
            in_specs=[
                pl.BlockSpec((1, n, n), lambda b: (b, 0, 0)),
                pl.BlockSpec((n, n), lambda b: (0, 0)),
                pl.BlockSpec((n, n), lambda b: (0, 0)),
                pl.BlockSpec((n, n), lambda b: (0, 0)),
            ],
            out_specs=pl.BlockSpec((1, H, W), lambda b: (b, 0, 0)),
            compiler_params=pltpu.CompilerParams(
                dimension_semantics=("parallel",),
                vmem_limit_bytes=32 * 1024 * 1024),
            cost_estimate=pre_cost,
        )(padded, self.gf_pre, self.Fr_pre, self.Fi_pre)        # already (B, H, W)

        # ----------------- gabor responses + block pooling -----------------
        be, N, nf, nb = self.be, self.N, self.n_filters, self.num_blocks
        gf_blk = self.gf_blk
        gpad = _sym_pad(pre, (be, be), "both")                   # (B, N, N)
        nbp = self.nb_pad
        gab_cost = pl.CostEstimate(
            flops=int(B * (12 * N ** 3 + nf * (8 * H * N * N + 8 * H * H * N))),
            transcendentals=int(B * nf * H * W),
            bytes_accessed=int(B * (4 * N * N + nf * 2 * N * N + nf * nbp * nbp * 4)))
        blocks = pl.pallas_call(
            functools.partial(_gabor_kernel, gf_blk=gf_blk),
            out_shape=jax.ShapeDtypeStruct((B, nf, nbp, nbp), jnp.float32),
            grid=(B, nf // gf_blk),
            in_specs=[
                pl.BlockSpec((1, N, N), lambda b, f: (b, 0, 0)),        # image
                pl.BlockSpec((gf_blk, N, N), lambda b, f: (f, 0, 0)),   # gabor block (bf16)
                pl.BlockSpec((N, N), lambda b, f: (0, 0)),              # Fr (full)
                pl.BlockSpec((N, N), lambda b, f: (0, 0)),              # Fi (full)
                pl.BlockSpec((H, N), lambda b, f: (0, 0)),              # Fr row crop
                pl.BlockSpec((H, N), lambda b, f: (0, 0)),              # Fi row crop
                pl.BlockSpec((N, W), lambda b, f: (0, 0)),              # Fr col crop
                pl.BlockSpec((N, W), lambda b, f: (0, 0)),              # Fi col crop
                pl.BlockSpec((nbp, H), lambda b, f: (0, 0)),            # A
                pl.BlockSpec((H, nbp), lambda b, f: (0, 0)),            # A^T
            ],
            out_specs=pl.BlockSpec((1, nf, nbp, nbp), lambda b, f: (b, 0, 0, 0)),
            scratch_shapes=[pltpu.VMEM((N, N), jnp.float32),     # resident image spectrum (re)
                            pltpu.VMEM((N, N), jnp.float32)],    # resident image spectrum (im)
            compiler_params=pltpu.CompilerParams(
                dimension_semantics=("parallel", "arbitrary"),
                vmem_limit_bytes=32 * 1024 * 1024),
            cost_estimate=gab_cost,
        )(gpad, self.gabors, self.Fr_gab, self.Fi_gab,
          self.Frr, self.Fir, self.Frc, self.Fic, self.A, self.At)

        v = blocks[:, :, :nb, :nb]                               # (B, nf, nb, nb)
        # torch: per filter, g[k:k+nw] = v.T.reshape(nw, 1)  (column-major flatten of v)
        g = jnp.transpose(v, (0, 1, 3, 2)).reshape(B, nf * nb * nb)
        return g


# ----------------------------------------------------------------------------- demo

if __name__ == "__main__":
    key = jax.random.PRNGKey(0)
    B, C, H, W = 2, 3, 32, 32
    x = jax.random.uniform(key, (B, C, H, W), dtype=jnp.float32)

    model = GISTPallas(orientations_per_scale=(4, 4), num_blocks=4,
                       fc_prefilt=4, image_size=(H, W), boundary_extension=8)
    g = model(x)
    g = jax.block_until_ready(g)
    assert g.shape == (B, model.n_features), g.shape
    assert bool(jnp.all(jnp.isfinite(g)))
    print("KERNEL_OK")
</pallas_src>

<mosaic_0001>
module attributes {stable_mosaic.version = 11 : i64} {
  func.func @_prefilt_kernel(%arg0: i32, %arg1: memref<1x42x42xf32, #tpu.memory_space<vmem>>, %arg2: memref<42x42xf32, #tpu.memory_space<vmem>>, %arg3: memref<42x42xf32, #tpu.memory_space<vmem>>, %arg4: memref<42x42xf32, #tpu.memory_space<vmem>>, %arg5: memref<1x32x32xf32, #tpu.memory_space<vmem>>) attributes {dimension_semantics = [#tpu.dimension_semantics<parallel>], iteration_bounds = array<i64: 2>, scalar_prefetch = 0 : i64, scratch_operands = 0 : i64, tpu.core_type = #tpu.core_type<tc>, window_params = [{transform_indices = @transform_0, window_bounds = array<i64: 1, 42, 42>}, {pipeline_mode = #tpu.pipeline_mode<synchronous>, transform_indices = @transform_1, window_bounds = array<i64: 42, 42>}, {pipeline_mode = #tpu.pipeline_mode<synchronous>, transform_indices = @transform_2, window_bounds = array<i64: 42, 42>}, {pipeline_mode = #tpu.pipeline_mode<synchronous>, transform_indices = @transform_3, window_bounds = array<i64: 42, 42>}, {transform_indices = @transform_4, window_bounds = array<i64: 1, 32, 32>}]} {
    %c0 = arith.constant 0 : index
    %c0_0 = arith.constant 0 : index
    %c0_1 = arith.constant 0 : index
    %0 = vector.load %arg1[%c0, %c0_0, %c0_1] : memref<1x42x42xf32, #tpu.memory_space<vmem>>, vector<1x42x42xf32>
    %1 = vector.shape_cast %0 : vector<1x42x42xf32> to vector<42x42xf32>
    %cst = arith.constant 1.000000e+00 : f32
    %2 = vector.broadcast %cst : f32 to vector<42x42xf32>
    %3 = arith.addf %1, %2 : vector<42x42xf32>
    %4 = math.log %3 : vector<42x42xf32>
    %c0_2 = arith.constant 0 : index
    %c0_3 = arith.constant 0 : index
    %5 = vector.load %arg2[%c0_2, %c0_3] : memref<42x42xf32, #tpu.memory_space<vmem>>, vector<42x42xf32>
    %c0_4 = arith.constant 0 : index
    %c0_5 = arith.constant 0 : index
    %6 = vector.load %arg3[%c0_4, %c0_5] : memref<42x42xf32, #tpu.memory_space<vmem>>, vector<42x42xf32>
    %c0_6 = arith.constant 0 : index
    %c0_7 = arith.constant 0 : index
    %7 = vector.load %arg4[%c0_6, %c0_7] : memref<42x42xf32, #tpu.memory_space<vmem>>, vector<42x42xf32>
    %cst_8 = arith.constant dense<0.000000e+00> : vector<42x42xf32>
    %8 = tpu.matmul %6, %4, %cst_8 {dimension_numbers = #tpu.dot_dimension_numbers<[1], [0], [0], [1], [0, 0, 1, 1], [], []>} : vector<42x42xf32>, vector<42x42xf32>, vector<42x42xf32> -> vector<42x42xf32>
    %cst_9 = arith.constant dense<0.000000e+00> : vector<42x42xf32>
    %9 = tpu.matmul %7, %4, %cst_9 {dimension_numbers = #tpu.dot_dimension_numbers<[1], [0], [0], [1], [0, 0, 1, 1], [], []>} : vector<42x42xf32>, vector<42x42xf32>, vector<42x42xf32> -> vector<42x42xf32>
    %cst_10 = arith.constant dense<0.000000e+00> : vector<42x42xf32>
    %10 = tpu.matmul %8, %6, %cst_10 {dimension_numbers = #tpu.dot_dimension_numbers<[1], [0], [0], [1], [0, 0, 1, 1], [], []>} : vector<42x42xf32>, vector<42x42xf32>, vector<42x42xf32> -> vector<42x42xf32>
    %cst_11 = arith.constant dense<0.000000e+00> : vector<42x42xf32>
    %11 = tpu.matmul %9, %7, %cst_11 {dimension_numbers = #tpu.dot_dimension_numbers<[1], [0], [0], [1], [0, 0, 1, 1], [], []>} : vector<42x42xf32>, vector<42x42xf32>, vector<42x42xf32> -> vector<42x42xf32>
    %12 = arith.subf %10, %11 : vector<42x42xf32>
    %cst_12 = arith.constant dense<0.000000e+00> : vector<42x42xf32>
    %13 = tpu.matmul %8, %7, %cst_12 {dimension_numbers = #tpu.dot_dimension_numbers<[1], [0], [0], [1], [0, 0, 1, 1], [], []>} : vector<42x42xf32>, vector<42x42xf32>, vector<42x42xf32> -> vector<42x42xf32>
    %cst_13 = arith.constant dense<0.000000e+00> : vector<42x42xf32>
    %14 = tpu.matmul %9, %6, %cst_13 {dimension_numbers = #tpu.dot_dimension_numbers<[1], [0], [0], [1], [0, 0, 1, 1], [], []>} : vector<42x42xf32>, vector<42x42xf32>, vector<42x42xf32> -> vector<42x42xf32>
    %15 = arith.addf %13, %14 : vector<42x42xf32>
    %16 = arith.mulf %12, %5 : vector<42x42xf32>
    %17 = arith.mulf %15, %5 : vector<42x42xf32>
    %cst_14 = arith.constant dense<0.000000e+00> : vector<42x42xf32>
    %18 = tpu.matmul %6, %16, %cst_14 {dimension_numbers = #tpu.dot_dimension_numbers<[1], [0], [0], [1], [0, 0, 1, 1], [], []>} : vector<42x42xf32>, vector<42x42xf32>, vector<42x42xf32> -> vector<42x42xf32>
    %cst_15 = arith.constant dense<0.000000e+00> : vector<42x42xf32>
    %19 = tpu.matmul %7, %17, %cst_15 {dimension_numbers = #tpu.dot_dimension_numbers<[1], [0], [0], [1], [0, 0, 1, 1], [], []>} : vector<42x42xf32>, vector<42x42xf32>, vector<42x42xf32> -> vector<42x42xf32>
    %20 = arith.addf %18, %19 : vector<42x42xf32>
    %cst_16 = arith.constant dense<0.000000e+00> : vector<42x42xf32>
    %21 = tpu.matmul %6, %17, %cst_16 {dimension_numbers = #tpu.dot_dimension_numbers<[1], [0], [0], [1], [0, 0, 1, 1], [], []>} : vector<42x42xf32>, vector<42x42xf32>, vector<42x42xf32> -> vector<42x42xf32>
    %cst_17 = arith.constant dense<0.000000e+00> : vector<42x42xf32>
    %22 = tpu.matmul %7, %16, %cst_17 {dimension_numbers = #tpu.dot_dimension_numbers<[1], [0], [0], [1], [0, 0, 1, 1], [], []>} : vector<42x42xf32>, vector<42x42xf32>, vector<42x42xf32> -> vector<42x42xf32>
    %23 = arith.subf %21, %22 : vector<42x42xf32>
    %cst_18 = arith.constant dense<0.000000e+00> : vector<42x42xf32>
    %24 = tpu.matmul %20, %6, %cst_18 {dimension_numbers = #tpu.dot_dimension_numbers<[1], [0], [0], [1], [0, 0, 1, 1], [], []>} : vector<42x42xf32>, vector<42x42xf32>, vector<42x42xf32> -> vector<42x42xf32>
    %cst_19 = arith.constant dense<0.000000e+00> : vector<42x42xf32>
    %25 = tpu.matmul %23, %7, %cst_19 {dimension_numbers = #tpu.dot_dimension_numbers<[1], [0], [0], [1], [0, 0, 1, 1], [], []>} : vector<42x42xf32>, vector<42x42xf32>, vector<42x42xf32> -> vector<42x42xf32>
    %26 = arith.addf %24, %25 : vector<42x42xf32>
    %27 = arith.subf %4, %26 : vector<42x42xf32>
    %28 = arith.truncf %6 : vector<42x42xf32> to vector<42x42xbf16>
    %29 = arith.truncf %7 : vector<42x42xf32> to vector<42x42xbf16>
    %30 = arith.mulf %27, %27 : vector<42x42xf32>
    %31 = arith.truncf %30 : vector<42x42xf32> to vector<42x42xbf16>
    %cst_20 = arith.constant dense<0.000000e+00> : vector<42x42xf32>
    %32 = tpu.matmul %28, %31, %cst_20 {dimension_numbers = #tpu.dot_dimension_numbers<[1], [0], [0], [1], [0, 0, 1, 1], [], []>} : vector<42x42xbf16>, vector<42x42xbf16>, vector<42x42xf32> -> vector<42x42xf32>
    %cst_21 = arith.constant dense<0.000000e+00> : vector<42x42xf32>
    %33 = tpu.matmul %29, %31, %cst_21 {dimension_numbers = #tpu.dot_dimension_numbers<[1], [0], [0], [1], [0, 0, 1, 1], [], []>} : vector<42x42xbf16>, vector<42x42xbf16>, vector<42x42xf32> -> vector<42x42xf32>
    %34 = arith.truncf %32 : vector<42x42xf32> to vector<42x42xbf16>
    %35 = arith.truncf %33 : vector<42x42xf32> to vector<42x42xbf16>
    %cst_22 = arith.constant dense<0.000000e+00> : vector<42x42xf32>
    %36 = tpu.matmul %34, %28, %cst_22 {dimension_numbers = #tpu.dot_dimension_numbers<[1], [0], [0], [1], [0, 0, 1, 1], [], []>} : vector<42x42xbf16>, vector<42x42xbf16>, vector<42x42xf32> -> vector<42x42xf32>
    %cst_23 = arith.constant dense<0.000000e+00> : vector<42x42xf32>
    %37 = tpu.matmul %35, %29, %cst_23 {dimension_numbers = #tpu.dot_dimension_numbers<[1], [0], [0], [1], [0, 0, 1, 1], [], []>} : vector<42x42xbf16>, vector<42x42xbf16>, vector<42x42xf32> -> vector<42x42xf32>
    %38 = arith.subf %36, %37 : vector<42x42xf32>
    %cst_24 = arith.constant dense<0.000000e+00> : vector<42x42xf32>
    %39 = tpu.matmul %34, %29, %cst_24 {dimension_numbers = #tpu.dot_dimension_numbers<[1], [0], [0], [1], [0, 0, 1, 1], [], []>} : vector<42x42xbf16>, vector<42x42xbf16>, vector<42x42xf32> -> vector<42x42xf32>
    %cst_25 = arith.constant dense<0.000000e+00> : vector<42x42xf32>
    %40 = tpu.matmul %35, %28, %cst_25 {dimension_numbers = #tpu.dot_dimension_numbers<[1], [0], [0], [1], [0, 0, 1, 1], [], []>} : vector<42x42xbf16>, vector<42x42xbf16>, vector<42x42xf32> -> vector<42x42xf32>
    %41 = arith.addf %39, %40 : vector<42x42xf32>
    %42 = arith.mulf %38, %5 : vector<42x42xf32>
    %43 = arith.truncf %42 : vector<42x42xf32> to vector<42x42xbf16>
    %44 = arith.mulf %41, %5 : vector<42x42xf32>
    %45 = arith.truncf %44 : vector<42x42xf32> to vector<42x42xbf16>
    %cst_26 = arith.constant dense<0.000000e+00> : vector<42x42xf32>
    %46 = tpu.matmul %28, %43, %cst_26 {dimension_numbers = #tpu.dot_dimension_numbers<[1], [0], [0], [1], [0, 0, 1, 1], [], []>} : vector<42x42xbf16>, vector<42x42xbf16>, vector<42x42xf32> -> vector<42x42xf32>
    %cst_27 = arith.constant dense<0.000000e+00> : vector<42x42xf32>
    %47 = tpu.matmul %29, %45, %cst_27 {dimension_numbers = #tpu.dot_dimension_numbers<[1], [0], [0], [1], [0, 0, 1, 1], [], []>} : vector<42x42xbf16>, vector<42x42xbf16>, vector<42x42xf32> -> vector<42x42xf32>
    %48 = arith.addf %46, %47 : vector<42x42xf32>
    %cst_28 = arith.constant dense<0.000000e+00> : vector<42x42xf32>
    %49 = tpu.matmul %28, %45, %cst_28 {dimension_numbers = #tpu.dot_dimension_numbers<[1], [0], [0], [1], [0, 0, 1, 1], [], []>} : vector<42x42xbf16>, vector<42x42xbf16>, vector<42x42xf32> -> vector<42x42xf32>
    %cst_29 = arith.constant dense<0.000000e+00> : vector<42x42xf32>
    %50 = tpu.matmul %29, %43, %cst_29 {dimension_numbers = #tpu.dot_dimension_numbers<[1], [0], [0], [1], [0, 0, 1, 1], [], []>} : vector<42x42xbf16>, vector<42x42xbf16>, vector<42x42xf32> -> vector<42x42xf32>
    %51 = arith.subf %49, %50 : vector<42x42xf32>
    %52 = arith.truncf %48 : vector<42x42xf32> to vector<42x42xbf16>
    %53 = arith.truncf %51 : vector<42x42xf32> to vector<42x42xbf16>
    %cst_30 = arith.constant dense<0.000000e+00> : vector<42x42xf32>
    %54 = tpu.matmul %52, %28, %cst_30 {dimension_numbers = #tpu.dot_dimension_numbers<[1], [0], [0], [1], [0, 0, 1, 1], [], []>} : vector<42x42xbf16>, vector<42x42xbf16>, vector<42x42xf32> -> vector<42x42xf32>
    %cst_31 = arith.constant dense<0.000000e+00> : vector<42x42xf32>
    %55 = tpu.matmul %53, %29, %cst_31 {dimension_numbers = #tpu.dot_dimension_numbers<[1], [0], [0], [1], [0, 0, 1, 1], [], []>} : vector<42x42xbf16>, vector<42x42xbf16>, vector<42x42xf32> -> vector<42x42xf32>
    %56 = arith.addf %54, %55 : vector<42x42xf32>
    %cst_32 = arith.constant dense<0.000000e+00> : vector<42x42xf32>
    %57 = tpu.matmul %53, %28, %cst_32 {dimension_numbers = #tpu.dot_dimension_numbers<[1], [0], [0], [1], [0, 0, 1, 1], [], []>} : vector<42x42xbf16>, vector<42x42xbf16>, vector<42x42xf32> -> vector<42x42xf32>
    %cst_33 = arith.constant dense<0.000000e+00> : vector<42x42xf32>
    %58 = tpu.matmul %52, %29, %cst_33 {dimension_numbers = #tpu.dot_dimension_numbers<[1], [0], [0], [1], [0, 0, 1, 1], [], []>} : vector<42x42xbf16>, vector<42x42xbf16>, vector<42x42xf32> -> vector<42x42xf32>
    %59 = arith.subf %57, %58 : vector<42x42xf32>
    %60 = arith.mulf %56, %56 : vector<42x42xf32>
    %61 = arith.mulf %59, %59 : vector<42x42xf32>
    %62 = arith.addf %60, %61 : vector<42x42xf32>
    %63 = math.sqrt %62 : vector<42x42xf32>
    %64 = math.sqrt %63 : vector<42x42xf32>
    %cst_34 = arith.constant 2.000000e-01 : f32
    %65 = vector.broadcast %cst_34 : f32 to vector<42x42xf32>
    %66 = arith.addf %65, %64 : vector<42x42xf32>
    %67 = arith.divf %27, %66 : vector<42x42xf32>
    %68 = vector.extract_strided_slice %67 {offsets = [5, 5], sizes = [32, 32], strides = [1, 1]} : vector<42x42xf32> to vector<32x32xf32>
    %c0_35 = arith.constant 0 : index
    %c0_36 = arith.constant 0 : index
    %c0_37 = arith.constant 0 : index
    %69 = vector.load %arg5[%c0_35, %c0_36, %c0_37] : memref<1x32x32xf32, #tpu.memory_space<vmem>>, vector<1x32x32xf32>
    %70 = vector.shape_cast %69 : vector<1x32x32xf32> to vector<32x32xf32>
    %71 = vector.shape_cast %68 : vector<32x32xf32> to vector<1x32x32xf32>
    tpu.vector_store %arg5[%c0_35, %c0_36, %c0_37], %71 {strides = array<i32>} : memref<1x32x32xf32, #tpu.memory_space<vmem>>, vector<1x32x32xf32>,
    return
  }
  func.func @transform_0(%arg0: i32) -> (i32, i32, i32) {
    %c0_i32 = arith.constant 0 : i32
    %c0_i32_0 = arith.constant 0 : i32
    %c0_i32_1 = arith.constant 0 : i32
    return %arg0, %c0_i32, %c0_i32_0 : i32, i32, i32
  }
  func.func @transform_1(%arg0: i32) -> (i32, i32) {
    %c0_i32 = arith.constant 0 : i32
    %c0_i32_0 = arith.constant 0 : i32
    %c0_i32_1 = arith.constant 0 : i32
    return %c0_i32, %c0_i32_0 : i32, i32
  }
  func.func @transform_2(%arg0: i32) -> (i32, i32) {
    %c0_i32 = arith.constant 0 : i32
    %c0_i32_0 = arith.constant 0 : i32
    %c0_i32_1 = arith.constant 0 : i32
    return %c0_i32, %c0_i32_0 : i32, i32
  }
  func.func @transform_3(%arg0: i32) -> (i32, i32) {
    %c0_i32 = arith.constant 0 : i32
    %c0_i32_0 = arith.constant 0 : i32
    %c0_i32_1 = arith.constant 0 : i32
    return %c0_i32, %c0_i32_0 : i32, i32
  }
  func.func @transform_4(%arg0: i32) -> (i32, i32, i32) {
    %c0_i32 = arith.constant 0 : i32
    %c0_i32_0 = arith.constant 0 : i32
    %c0_i32_1 = arith.constant 0 : i32
    return %arg0, %c0_i32, %c0_i32_0 : i32, i32, i32
  }
}

</mosaic_0001>

<bundles_post_ra>
// kernel: tpu_custom_call.1
= control target key start
LH: loop header
LB: loop body
LE: loop exit
PB: predicated region body
PF: predicated region fallthrough
CT: control target
= control target key end

     0   :  { %9 = vsyncpa [#allocation3], 0  ;;  %s4657_s0 = inlined_call_operand.vmem [shape: f32[2,42,42], index: 0, kind: input, shape index: {}]   ;;  %s4658_s1 = inlined_call_operand.vmem [shape: f32[42,42], index: 1, kind: input, shape index: {}]   ;;  %s4659_s2 = inlined_call_operand.vmem [shape: f32[42,42], index: 2, kind: input, shape index: {}]   ;;  %s4660_s3 = inlined_call_operand.vmem [shape: f32[42,42], index: 3, kind: input, shape index: {}]   ;;  %s4661_s4 = inlined_call_operand.hbm [shape: f32[2,32,32], index: 4, kind: output, shape index: {}]  }
   0x1   :  { %11 = vsyncpa [#allocation3 + $0x1], 0  ;;  %s3936_s15 = smov 0   ;;  %s3938_s16 = smov 0  }
   0x2   :  { %s3940_s17 = smov 0   ;;  %s3942_s18 = smov 0  }
   0x3 LB: > { %s3957_s19 = sadd.s32 4294967295, %s3902_s18   ;;  %s2660_s20 = sadd.s32 4294967294, %s3902_s18   ;;  %s3902_s18 = sphi %s3942_s18, %s4669_s18   ;;  %s3898_s17 = sphi %s3940_s17, %s4668_s17   ;;  %s3894_s16 = sphi %s3938_s16, %s4667_s16   ;;  %s3890_s15 = sphi %s3936_s15, %s4666_s15  }
   0x4   : > { %s3961_s21 = sadd.s32 1, %s3902_s18   ;;  %s113_s22 = sadd.s32 1, %s3898_s17 }
   0x5   : > { %s110_s23 = ssub.s32 %s3902_s18, %s3961_s21  ;;  %p123_p0 = scmp.ne.s32.totalorder %s3898_s17, %s3894_s16 }
   0x6   : > { %p111_p1 = scmp.eq.s32.totalorder %s110_s23, 0  ;;  %p124_p2 = scmp.eq.s32.totalorder %s3957_s19, 1 }
   0x7   : > { %p129_p3 = scmp.ne.s32.totalorder %s3894_s16, %s3890_s15  ;;  %p130_p4 = scmp.eq.s32.totalorder %s2660_s20, 1 }
   0x8   : > { %s3972_s24 = scalar_select %p111_p1, %s3898_s17, %s113_s22  }
   0x9   : > { %p3974_p5 = por %p124_p2, %p123_p0  ;;  %p3978_p6 = por %p130_p4, %p129_p3 }
   0xa   : > { %p2663_p7 = scmp.ge.s32.totalorder %s3902_s18, 1  ;;  %p165_p8 = scmp.lt.s32.totalorder %s3902_s18, 3 }
   0xc   : > { %p166_p9 = pnand %p2663_p7, %p165_p8 }
   0xd   : > { %p191_p10 = scmp.lt.s32.totalorder (!%p166_p9), %s3957_s19, 1  ;;  %v3988_v0 = vld [vmem:[%s4659_s2] sm:$0xff] (!%p166_p9)  ;;  %vm239_vm0 = vcmask (!%p166_p9), 343040   ;;  %v3993_v1 = vld [vmem:[%s4659_s2 + $0x8] sm:$0xff] (!%p166_p9)  ;;  %v4004_v3 = vld [vmem:[%s4659_s2 + $0x10] sm:$0xff] (!%p166_p9)  ;;  %vm258_vm1 = vcmask (!%p166_p9), 1041408  }
   0xe   : > { %169 = sbr.rel (%p166_p9) target bundleno = 2208 (0x8a0), region = 36  ;;  %3038 = vmatprep.mubr.msk.f32.mxu1 (!%p166_p9), %vm239_vm0, %v3988_v0  ;;  %v3999_v2 = vpack.c.bf16 (!%p166_p9), %v3993_v1, %v3988_v0  ;;  %v4009_v4 = vld [vmem:[%s4659_s2 + $0x18] sm:$0xff] (!%p166_p9)  ;;  %v4020_v6 = vld [vmem:[%s4659_s2 + $0x20] sm:$0xff] (!%p166_p9)  ;;  %v4025_v7 = vld [vmem:[%s4659_s2 + $0x28] sm:$0x3] (!%p166_p9)  ;;  %vm3904_vm2 = vmmov (!%p166_p9), 1  }
   0xf   : > { %v4014_v5 = vpack.c.bf16 (!%p166_p9), %v4009_v4, %v4004_v3  ;;  %v4030_v8 = vpack.c.bf16 (!%p166_p9), %v4025_v7, %v4020_v6  ;;  %vm4036_vm3 = vmpackc.low (!%p166_p9), %vm258_vm1, %vm3904_vm2  ;;  %v4081_v37 = vld [vmem:[%s4660_s3] sm:$0xff] (!%p166_p9)  ;;  %v4086_v38 = vld [vmem:[%s4660_s3 + $0x8] sm:$0xff] (!%p166_p9)  ;;  %vm3906_vm4 = vmmov (!%p166_p9), 0   ;;  %vm1556_vm5 = vcmask (!%p166_p9), 1044480   ;;  %s3907_s8 = smov (!%p166_p9), 123   ;;  %s2797_s13 = sshll.u32 (!%p166_p9), %s3957_s19, 9 }
  0x10   : > { %3559 = vmatprep.subr.bf16.mxu0 (!%p166_p9), %v3999_v2  ;;  %v4092_v39 = vpack.c.bf16 (!%p166_p9), %v4086_v38, %v4081_v37  ;;  %v4103_v40 = vld [vmem:[%s4660_s3 + $0x10] sm:$0xff] (!%p166_p9)  ;;  %v4108_v41 = vld [vmem:[%s4660_s3 + $0x18] sm:$0xff] (!%p166_p9)  ;;  %v4122_v43 = vld [vmem:[%s4660_s3 + $0x20] sm:$0xff] (!%p166_p9)  ;;  %s4614_s22 = scalar_lea.hbm (!%p166_p9), %s4661_s4, %s2797_s13 }
  0x11   : > { %3561 = vmatpush3.bf16.msra.mxu0 (!%p166_p9), %v3999_v2  ;;  %v4112_v42 = vpack.c.bf16 (!%p166_p9), %v4108_v41, %v4103_v40  ;;  %v4127_v44 = vld [vmem:[%s4660_s3 + $0x28] sm:$0x3] (!%p166_p9) }
  0x12   : > { %3563 = vmatprep.subr.bf16.mxu0 (!%p166_p9), %v4014_v5  ;;  %v4132_v45 = vpack.c.bf16 (!%p166_p9), %v4127_v44, %v4122_v43 }
  0x15   : > { %s192_s9 = scalar_select %p191_p10, %s3957_s19, 1  ;;  %3565 = vmatpush3.bf16.msra.mxu0 %v4014_v5 }
  0x16   : > { %3568 = vmatprep.subr.msk.bf16.mxu0 %vm4036_vm3, %v4030_v8  ;;  %s3908_s19 = smov [#allocation2]  }
  0x17   : > { %s3752_s10 = smul.u32 48, %s192_s9  ;;  %s188_s9 = sand.u32 1, %s3894_s16  }
  0x18   : > { %s3844_s28 = sshll.u32 %s3908_s19, 4  ;;  %s3845_s28 = int_to_ptr.vmem [resolvable:$false] %s3844_s28 }
  0x19   : > { %s195_s23 = scalar_lea.vmem %s4657_s0, %s3752_s10  ;;  %3571 = vmatpush3.bf16.msk.msra.mxu0 %vm4036_vm3, %v4030_v8  ;;  %s2664_s10 = sshll.u32 %s188_s9, 5 }
  0x1a   : > { %v197_v9 = vld [vmem:[%s195_s23] sm:$0xff]  ;;  %v198_v10 = vld [vmem:[%s195_s23 + $0x8] sm:$0xff]  ;;  %v199_v11 = vld [vmem:[%s195_s23 + $0x10] sm:$0xff]  ;;  %3587 = vmatprep.subr.bf16.mxu0 %v3999_v2  ;;  %s190_s11 = scalar_lea.vmem [#allocation2], %s2664_s10  ;;  %s3846_s29 = scalar_lea.vmem %s3845_s28, 1024 }
  0x1b   : > { %v203_v12 = vadd.f32 1.0, %v197_v9  ;;  %v204_v13 = vadd.f32 1.0, %v198_v10  ;;  %v200_v14 = vld [vmem:[%s195_s23 + $0x18] sm:$0xff]  ;;  %v205_v15 = vadd.f32 1.0, %v199_v11  ;;  %v201_v16 = vld [vmem:[%s195_s23 + $0x20] sm:$0xff]  ;;  %v4198_v9 = vld [vmem:[%s4658_s1 + $0x8] sm:$0xff] }
  0x1c   : > { %v206_v18 = vadd.f32 1.0, %v200_v14  ;;  %v202_v19 = vld [vmem:[%s195_s23 + $0x28] sm:$0x3]  ;;  %v207_v20 = vadd.f32 1.0, %v201_v16  ;;  %s2598_s12 = sshll.u32 %s190_s11, 4  ;;  %s4616_s23 = scalar_lea.sflag [#allocation3], %s188_s9  ;;  %s4609_s12 = int_to_ptr.vmem [resolvable:$true] %s2598_s12 }
  0x1d   : > { %3798 = vlog2.f32 %v203_v12  ;;  %v208_v21 = vadd.f32 1.0, %v202_v19  ;;  %v4203_v12 = vld [vmem:[%s4658_s1] sm:$0xff]  ;;  %s3840_s27 = scalar_lea.vmem %s4609_s12, 512  ;;  %p3847_p0 = scmp.lt.s32.totalorder %s4609_s12, %s3845_s28 }
  0x1e   : > { %3800 = vlog2.f32 %v204_v13  ;;  %p3841_p11 = scmp.ne.s32.totalorder %s4609_s12, %s3840_s27  ;;  %p3848_p1 = scmp.lt.s32.totalorder %s3846_s29, %s3840_s27 }
  0x1f   : > { %3802 = vlog2.f32 %v205_v15 }
  0x20   : > { %3804 = vlog2.f32 %v206_v18  ;;  %v4210_v18 = vld [vmem:[%s4658_s1 + $0x18] sm:$0xff]  ;;  %p3842_p12 = pnand %p3841_p11, %p3974_p5  ;;  %p3849_p2 = por %p3848_p1, %p3847_p0 }
  0x21   : > { %3806 = vlog2.f32 %v207_v20 }
  0x22   : > { %3808 = vlog2.f32 %v208_v21  ;;  %v4215_v21 = vld [vmem:[%s4658_s1 + $0x10] sm:$0xff]  ;;  %p3843_p13 = pneg %p3842_p12 }
  0x24   : > { %p3850_p3 = pnand %p3849_p2, %p3843_p13 }
  0x27   : > { %v3799_v22 = vpop.eup %3798 }
  0x28   : > { %v3801_v23 = vpop.eup %3800  ;;  %v4048_v24 = vmul.f32 0.6931472, %v3799_v22 }
  0x29   : > { %v3803_v25 = vpop.eup %3802  ;;  %v4050_v26 = vmul.f32 0.6931472, %v3801_v23 }
  0x2a   : > { %v3805_v27 = vpop.eup %3804  ;;  %v4052_v28 = vmul.f32 0.6931472, %v3803_v25 }
  0x2b   : > { %v3807_v29 = vpop.eup %3806  ;;  %v3530_v30 = vpack.c.bf16 %v4050_v26, %v4048_v24  ;;  %v4056_v31 = vmul.f32 0.6931472, %v3805_v27 }
  0x2c   : > { %v3809_v32 = vpop.eup %3808  ;;  %v4058_v33 = vmul.f32 0.6931472, %v3807_v29 }
  0x2d   : > { %3531 = vmatprep.subr.bf16.mxu1 %v3530_v30  ;;  %v3534_v34 = vpack.c.bf16 %v4056_v31, %v4052_v28  ;;  %v4062_v35 = vmul.f32 0.6931472, %v3809_v32 }
  0x2e   : > { %3533 = vmatpush3.bf16.msra.mxu1 %v3530_v30 }
  0x2f   : > { %3535 = vmatprep.subr.bf16.mxu1 %v3534_v34  ;;  %v3538_v36 = vpack.c.bf16 %v4062_v35, %v4058_v33 }
  0x32   : > { %3537 = vmatpush3.bf16.msra.mxu1 %v3534_v34 }
  0x33   : > { %3540 = vmatprep.subr.msk.bf16.mxu1 %vm4036_vm3, %v3538_v36 }
  0x36   : > { %3543 = vmatpush3.bf16.msk.msra.mxu1 %vm4036_vm3, %v3538_v36 }
  0x37   : > { %3545 = vmatprep.subr.bf16.mxu1 %v3530_v30 }
  0x39   : > { %3039 = vmatmul.mubr.msk.f32.vlgmr.msra.gmra.mrb[0].mxu1 %vm239_vm0, %v3993_v1 }
  0x3a   : > { %3547 = vmatpush3.bf16.msra.mxu1 %v3530_v30  ;;  %3041 = vmatprep.mubr.msk.f32.mxu1 %vm239_vm0, %v4004_v3  ;;  %v4224_v30 = vld [vmem:[%s4658_s1 + $0x28] sm:$0x3] }
  0x3b   : > { %3549 = vmatprep.subr.bf16.mxu1 %v3534_v34 }
  0x3d   : > { %3042 = vmatmul.mubr.msk.f32.gmra.mrb[2].mxu1 %vm239_vm0, %v4009_v4 }
  0x3e   : > { %3551 = vmatpush3.bf16.msra.mxu1 %v3534_v34  ;;  %3044 = vmatprep.mubr.msk.f32.mxu1 %vm239_vm0, %v4020_v6 }
  0x3f   : > { %3554 = vmatprep.subr.msk.bf16.mxu1 %vm4036_vm3, %v3538_v36 }
  0x41   : > { %3045 = vmatmul.mubr.msk.f32.gmra.mrb[4].mxu1 %vm239_vm0, %v4025_v7 }
  0x42   : > { %3557 = vmatpush3.bf16.msk.msra.mxu1 %vm4036_vm3, %v3538_v36  ;;  %3059 = vmatprep.mubr.msk.f32.mxu1 %vm239_vm0, %v4081_v37  ;;  %v4229_v36 = vld [vmem:[%s4658_s1 + $0x20] sm:$0xff] }
  0x43   : > { %3573 = vmatprep.subr.bf16.mxu1 %v4092_v39 }
  0x45   : > { %3060 = vmatmul.mubr.msk.f32.vlgmr.msra.gmra.mrb[6].mxu1 %vm239_vm0, %v4086_v38 }
  0x46   : > { %3062 = vmatprep.mubr.msk.f32.mxu1 %vm239_vm0, %v4103_v40  ;;  %3575 = vmatpush3.bf16.msra.mxu1 %v4092_v39 }
  0x47   : > { %3577 = vmatprep.subr.bf16.mxu1 %v4112_v42 }
  0x49   : > { %3063 = vmatmul.mubr.msk.f32.gmra.mrb[8].mxu1 %vm239_vm0, %v4108_v41 }
  0x4a   : > { %3065 = vmatprep.mubr.msk.f32.mxu1 %vm239_vm0, %v4122_v43  ;;  %3579 = vmatpush3.bf16.msra.mxu1 %v4112_v42 }
  0x4b   : > { %3582 = vmatprep.subr.msk.bf16.mxu1 %vm4036_vm3, %v4132_v45 }
  0x4d   : > { %3066 = vmatmul.mubr.msk.f32.gmra.mrb[10].mxu1 %vm239_vm0, %v4127_v44 }
  0x4e   : > { %3585 = vmatpush3.bf16.msk.msra.mxu1 %vm4036_vm3, %v4132_v45 }
 0x10c   : > { %v3040_v46 = vpop.f32.mrb[0].mxu1 }
 0x10d   : > { %v328_v47 = vpop.f32.mrb[1].mxu1 }
 0x10e   : > { %3080 = vmatprep.mubr.msk.f32.mxu0 %vm239_vm0, %v328_v47 }
 0x10f   : > { %3081 = vmatmul.mubr.msk.f32.vlgmr.msra.gmra.mrb[0].mxu0 %vm239_vm0, %v3040_v46 }
 0x110   : > { %v3043_v48 = vpop.f32.mrb[2].mxu1  ;;  %3589 = vmatpush3.bf16.msra.mxu0 %v3999_v2 }
 0x111   : > { %v338_v49 = vpop.f32.mrb[3].mxu1  ;;  %3591 = vmatprep.subr.bf16.mxu0 %v4014_v5 }
 0x112   : > { %3083 = vmatprep.mubr.msk.f32.mxu0 %vm239_vm0, %v338_v49 }
 0x113   : > { %3084 = vmatmul.mubr.msk.f32.gmra.mrb[2].mxu0 %vm239_vm0, %v3043_v48 }
 0x114   : > { %v3046_v50 = vpop.f32.mrb[4].mxu1  ;;  %3593 = vmatpush3.bf16.msra.mxu0 %v4014_v5 }
 0x115   : > { %v348_v51 = vpop.f32.mrb[5].mxu1  ;;  %3596 = vmatprep.subr.msk.bf16.mxu0 %vm4036_vm3, %v4030_v8 }
 0x116   : > { %3086 = vmatprep.mubr.msk.f32.mxu0 %vm239_vm0, %v348_v51 }
 0x117   : > { %3087 = vmatmul.mubr.msk.f32.gmra.mrb[4].mxu0 %vm239_vm0, %v3046_v50 }
 0x118   : > { %v3061_v52 = vpop.f32.mrb[6].mxu1  ;;  %3599 = vmatpush3.bf16.msk.msra.mxu0 %vm4036_vm3, %v4030_v8 }
 0x119   : > { %v441_v53 = vpop.f32.mrb[7].mxu1  ;;  %3601 = vmatprep.subr.bf16.mxu0 %v4092_v39 }
 0x11a   : > { %3101 = vmatprep.mubr.msk.f32.mxu1 %vm239_vm0, %v441_v53  ;;  %3122 = vmatprep.mubr.msk.f32.mxu0 %vm239_vm0, %v441_v53 }
 0x11b   : > { %3102 = vmatmul.mubr.msk.f32.vlgmr.msra.gmra.mrb[12].mxu1 %vm239_vm0, %v3061_v52  ;;  %3123 = vmatmul.mubr.msk.f32.vlgmr.msra.gmra.mrb[6].mxu0 %vm239_vm0, %v3061_v52 }
 0x11c   : > { %v3064_v54 = vpop.f32.mrb[8].mxu1  ;;  %3603 = vmatpush3.bf16.msra.mxu0 %v4092_v39 }
 0x11d   : > { %v451_v55 = vpop.f32.mrb[9].mxu1  ;;  %3605 = vmatprep.subr.bf16.mxu0 %v4112_v42 }
 0x11e   : > { %3104 = vmatprep.mubr.msk.f32.mxu1 %vm239_vm0, %v451_v55  ;;  %3125 = vmatprep.mubr.msk.f32.mxu0 %vm239_vm0, %v451_v55 }
 0x11f   : > { %3105 = vmatmul.mubr.msk.f32.gmra.mrb[14].mxu1 %vm239_vm0, %v3064_v54  ;;  %3126 = vmatmul.mubr.msk.f32.gmra.mrb[8].mxu0 %vm239_vm0, %v3064_v54 }
 0x120   : > { %v3067_v56 = vpop.f32.mrb[10].mxu1  ;;  %3607 = vmatpush3.bf16.msra.mxu0 %v4112_v42 }
 0x121   : > { %v461_v57 = vpop.f32.mrb[11].mxu1  ;;  %3610 = vmatprep.subr.msk.bf16.mxu0 %vm4036_vm3, %v4132_v45 }
 0x122   : > { %3107 = vmatprep.mubr.msk.f32.mxu1 %vm239_vm0, %v461_v57  ;;  %3128 = vmatprep.mubr.msk.f32.mxu0 %vm239_vm0, %v461_v57 }
 0x123   : > { %3108 = vmatmul.mubr.msk.f32.gmra.mrb[16].mxu1 %vm239_vm0, %v3067_v56  ;;  %3129 = vmatmul.mubr.msk.f32.gmra.mrb[10].mxu0 %vm239_vm0, %v3067_v56 }
 0x124   : > { %3613 = vmatpush3.bf16.msk.msra.mxu0 %vm4036_vm3, %v4132_v45  ;;  %3143 = vmatprep.mubr.msk.f32.mxu0 %vm239_vm0, %v328_v47 }
 0x125   : > { %3164 = vmatprep.mubr.msk.f32.mxu1 %vm239_vm0, %v4081_v37 }
 0x127   : > { %3144 = vmatmul.mubr.msk.f32.vlgmr.msra.gmra.mrb[6].mxu0 %vm239_vm0, %v3040_v46 }
 0x128   : > { %3146 = vmatprep.mubr.msk.f32.mxu0 %vm239_vm0, %v338_v49 }
 0x12b   : > { %3147 = vmatmul.mubr.msk.f32.gmra.mrb[8].mxu0 %vm239_vm0, %v3043_v48 }
 0x12c   : > { %3149 = vmatprep.mubr.msk.f32.mxu0 %vm239_vm0, %v348_v51 }
 0x12f   : > { %3150 = vmatmul.mubr.msk.f32.gmra.mrb[10].mxu0 %vm239_vm0, %v3046_v50 }
 0x130   : > { %3206 = vmatprep.mubr.msk.f32.mxu0 %vm239_vm0, %v3988_v0 }
 0x1e2   : > { %v3082_v58 = vpop.f32.mrb[0].mxu0 }
 0x1e3   : > { %v556_v59 = vpop.f32.mrb[1].mxu0 }
 0x1e6   : > { %v3085_v60 = vpop.f32.mrb[2].mxu0 }
 0x1e7   : > { %v566_v61 = vpop.f32.mrb[3].mxu0 }
 0x1ea   : > { %v3088_v62 = vpop.f32.mrb[4].mxu0 }
 0x1eb   : > { %v576_v63 = vpop.f32.mrb[5].mxu0 }
 0x1ee   : > { %v3103_v10 = vpop.f32.mrb[12].mxu1 }
 0x1ef   : > { %v701_v11 = vsub.f32 %v3082_v58, %v3103_v10  ;;  %v671_v13 = vpop.f32.mrb[13].mxu1 }
 0x1f0   : > { %v700_v14 = vsub.f32 %v556_v59, %v671_v13 }
 0x1f1   : > { %v897_v15 = vmul.f32 %v701_v11, %v4198_v9 }
 0x1f2   : > { %v896_v16 = vmul.f32 %v700_v14, %v4203_v12  ;;  %v3106_v19 = vpop.f32.mrb[14].mxu1 }
 0x1f3   : > { %v703_v20 = vsub.f32 %v3085_v60, %v3106_v19  ;;  %v681_v22 = vpop.f32.mrb[15].mxu1 }
 0x1f4   : > { %v4217_v23 = vpack.c.bf16 %v897_v15, %v896_v16  ;;  %v702_v25 = vsub.f32 %v566_v61, %v681_v22 }
 0x1f5   : > { %v899_v27 = vmul.f32 %v703_v20, %v4210_v18 }
 0x1f6   : > { %v898_v29 = vmul.f32 %v702_v25, %v4215_v21  ;;  %v3109_v32 = vpop.f32.mrb[16].mxu1 }
 0x1f7   : > { %v705_v34 = vsub.f32 %v3088_v62, %v3109_v32  ;;  %v691_v46 = vpop.f32.mrb[17].mxu1 }
 0x1f8   : > { %v3632_v47 = vpack.c.bf16 %v899_v27, %v898_v29  ;;  %v704_v48 = vsub.f32 %v576_v63, %v691_v46  ;;  %v3905_v46 = vmov 0.0  }
 0x1f9   : > { %v901_v49 = vmul.f32 %v705_v34, %v4224_v30 }
 0x1fa   : > { %v900_v50 = vmul.f32 %v704_v48, %v4229_v36  ;;  %v3145_v51 = vpop.f32.mrb[6].mxu0 }
 0x1fb   : > { %v903_v52 = vmul.f32 %v3145_v51, %v4198_v9  ;;  %v867_v53 = vpop.f32.mrb[7].mxu0 }
 0x1fc   : > { %v3636_v54 = vpack.c.bf16 %v901_v49, %v900_v50  ;;  %v902_v55 = vmul.f32 %v867_v53, %v4203_v12 }
 0x1fe   : > { %v3614_v56 = vpack.c.bf16 %v903_v52, %v902_v55  ;;  %v3148_v57 = vpop.f32.mrb[8].mxu0 }
 0x1ff   : > { %v905_v58 = vmul.f32 %v3148_v57, %v4210_v18  ;;  %v877_v59 = vpop.f32.mrb[9].mxu0 }
 0x200   : > { %v904_v60 = vmul.f32 %v877_v59, %v4215_v21  ;;  %3615 = vmatprep.subr.bf16.mxu1 %v3614_v56  ;;  %3643 = vmatprep.subr.bf16.mxu0 %v3614_v56 }
 0x201   : > { %3617 = vmatpush3.bf16.msra.mxu1 %v3614_v56  ;;  %3645 = vmatpush3.bf16.msra.mxu0 %v3614_v56 }
 0x202   : > { %v3618_v61 = vpack.c.bf16 %v905_v58, %v904_v60  ;;  %v3151_v62 = vpop.f32.mrb[10].mxu0 }
 0x203   : > { %v907_v63 = vmul.f32 %v3151_v62, %v4224_v30  ;;  %v887_v10 = vpop.f32.mrb[11].mxu0 }
 0x204   : > { %v906_v11 = vmul.f32 %v887_v10, %v4229_v36  ;;  %3619 = vmatprep.subr.bf16.mxu1 %v3618_v61  ;;  %3647 = vmatprep.subr.bf16.mxu0 %v3618_v61 }
 0x205   : > { %3621 = vmatpush3.bf16.msra.mxu1 %v3618_v61  ;;  %3649 = vmatpush3.bf16.msra.mxu0 %v3618_v61 }
 0x206   : > { %v3622_v13 = vpack.c.bf16 %v907_v63, %v906_v11  ;;  %v4412_v63 = vsel %vm1556_vm5, %v4132_v45, 0 }
 0x208   : > { %3624 = vmatprep.subr.msk.bf16.mxu1 %vm4036_vm3, %v3622_v13  ;;  %3652 = vmatprep.subr.msk.bf16.mxu0 %vm4036_vm3, %v3622_v13 }
 0x209   : > { %3627 = vmatpush3.bf16.msk.msra.mxu1 %vm4036_vm3, %v3622_v13  ;;  %3655 = vmatpush3.bf16.msk.msra.mxu0 %vm4036_vm3, %v3622_v13 }
 0x20a   : > { %3629 = vmatprep.subr.bf16.mxu1 %v4217_v23  ;;  %3671 = vmatprep.subr.bf16.mxu0 %v4092_v39 }
 0x20c   : > { %3165 = vmatmul.mubr.msk.f32.vlgmr.msra.gmra.mrb[18].mxu1 %vm239_vm0, %v4086_v38  ;;  %3207 = vmatmul.mubr.msk.f32.vlgmr.msra.gmra.mrb[12].mxu0 %vm239_vm0, %v3993_v1 }
 0x20d   : > { %3631 = vmatpush3.bf16.msra.mxu1 %v4217_v23  ;;  %3167 = vmatprep.mubr.msk.f32.mxu1 %vm239_vm0, %v4103_v40 }
 0x20e   : > { %3633 = vmatprep.subr.bf16.mxu1 %v3632_v47  ;;  %3209 = vmatprep.mubr.msk.f32.mxu0 %vm239_vm0, %v4004_v3 }
 0x20f   : > { %3673 = vmatpush3.bf16.msra.mxu0 %v4092_v39 }
 0x210   : > { %3168 = vmatmul.mubr.msk.f32.gmra.mrb[20].mxu1 %vm239_vm0, %v4108_v41  ;;  %3210 = vmatmul.mubr.msk.f32.gmra.mrb[14].mxu0 %vm239_vm0, %v4009_v4 }
 0x211   : > { %3635 = vmatpush3.bf16.msra.mxu1 %v3632_v47  ;;  %3170 = vmatprep.mubr.msk.f32.mxu1 %vm239_vm0, %v4122_v43 }
 0x212   : > { %3638 = vmatprep.subr.msk.bf16.mxu1 %vm4036_vm3, %v3636_v54  ;;  %3212 = vmatprep.mubr.msk.f32.mxu0 %vm239_vm0, %v4020_v6 }
 0x213   : > { %3675 = vmatprep.subr.bf16.mxu0 %v4112_v42 }
 0x214   : > { %3171 = vmatmul.mubr.msk.f32.gmra.mrb[22].mxu1 %vm239_vm0, %v4127_v44  ;;  %3213 = vmatmul.mubr.msk.f32.gmra.mrb[16].mxu0 %vm239_vm0, %v4025_v7 }
 0x215   : > { %3641 = vmatpush3.bf16.msk.msra.mxu1 %vm4036_vm3, %v3636_v54  ;;  %3185 = vmatprep.mubr.msk.f32.mxu1 %vm239_vm0, %v3988_v0 }
 0x216   : > { %3657 = vmatprep.subr.bf16.mxu1 %v4217_v23  ;;  %3677 = vmatpush3.bf16.msra.mxu0 %v4112_v42 }
 0x217   : > { %3680 = vmatprep.subr.msk.bf16.mxu0 %vm4036_vm3, %v4132_v45 }
 0x218   : > { %3186 = vmatmul.mubr.msk.f32.vlgmr.msra.gmra.mrb[18].mxu1 %vm239_vm0, %v3993_v1 }
 0x219   : > { %3659 = vmatpush3.bf16.msra.mxu1 %v4217_v23  ;;  %3188 = vmatprep.mubr.msk.f32.mxu1 %vm239_vm0, %v4004_v3 }
 0x21a   : > { %3661 = vmatprep.subr.bf16.mxu1 %v3632_v47  ;;  %3683 = vmatpush3.bf16.msk.msra.mxu0 %vm4036_vm3, %v4132_v45 }
 0x21b   : > { %3685 = vmatprep.subr.bf16.mxu0 %v3999_v2 }
 0x21c   : > { %3189 = vmatmul.mubr.msk.f32.gmra.mrb[20].mxu1 %vm239_vm0, %v4009_v4 }
 0x21d   : > { %3663 = vmatpush3.bf16.msra.mxu1 %v3632_v47  ;;  %3191 = vmatprep.mubr.msk.f32.mxu1 %vm239_vm0, %v4020_v6 }
 0x21e   : > { %3666 = vmatprep.subr.msk.bf16.mxu1 %vm4036_vm3, %v3636_v54 }
 0x220   : > { %3192 = vmatmul.mubr.msk.f32.gmra.mrb[22].mxu1 %vm239_vm0, %v4025_v7 }
 0x221   : > { %3669 = vmatpush3.bf16.msk.msra.mxu1 %vm4036_vm3, %v3636_v54  ;;  %3227 = vmatprep.mubr.msk.f32.mxu1 %vm239_vm0, %v4081_v37 }
 0x222   : > { %3278 = vmatprep.subr.bf16.mxu1 %v3905_v46 }
 0x224   : > { %3228 = vmatmul.mubr.msk.f32.vlgmr.msra.gmra.mrb[24].mxu1 %vm239_vm0, %v4086_v38 }
 0x225   : > { %3230 = vmatprep.mubr.msk.f32.mxu1 %vm239_vm0, %v4103_v40 }
 0x228   : > { %3231 = vmatmul.mubr.msk.f32.gmra.mrb[26].mxu1 %vm239_vm0, %v4108_v41 }
 0x229   : > { %3233 = vmatprep.mubr.msk.f32.mxu1 %vm239_vm0, %v4122_v43 }
 0x22c   : > { %3234 = vmatmul.mubr.msk.f32.gmra.mrb[28].mxu1 %vm239_vm0, %v4127_v44 }
 0x22d   : > { %3284 = vmatprep.mubr.msk.bf16.mxu1 %vm3906_vm4, %v3905_v46 }
 0x2df   : > { %v3208_v0 = vpop.f32.mrb[12].mxu0 }
 0x2e0   : > { %v1170_v1 = vpop.f32.mrb[13].mxu0 }
 0x2e3   : > { %v3211_v3 = vpop.f32.mrb[14].mxu0 }
 0x2e4   : > { %v1180_v4 = vpop.f32.mrb[15].mxu0 }
 0x2e7   : > { %v3214_v6 = vpop.f32.mrb[16].mxu0 }
 0x2e8   : > { %v1190_v7 = vpop.f32.mrb[17].mxu0 }
 0x2eb   : > { %v3187_v37 = vpop.f32.mrb[18].mxu1 }
 0x2ec   : > { %v1075_v38 = vpop.f32.mrb[19].mxu1 }
 0x2ef   : > { %v3190_v14 = vpop.f32.mrb[20].mxu1 }
 0x2f0   : > { %v1085_v15 = vpop.f32.mrb[21].mxu1 }
 0x2f3   : > { %v3193_v40 = vpop.f32.mrb[22].mxu1 }
 0x2f4   : > { %v1095_v16 = vpop.f32.mrb[23].mxu1 }
 0x2f7   : > { %v3229_v19 = vpop.f32.mrb[24].mxu1 }
 0x2f8   : > { %v1295_v41 = vsub.f32 %v3208_v0, %v3229_v19  ;;  %v1265_v20 = vpop.f32.mrb[25].mxu1 }
 0x2f9   : > { %v1294_v22 = vsub.f32 %v1170_v1, %v1265_v20 }
 0x2fb   : > { %v3232_v43 = vpop.f32.mrb[26].mxu1  ;;  %3248 = vmatprep.mubr.msk.f32.mxu0 %vm239_vm0, %v1294_v22 }
 0x2fc   : > { %v1297_v44 = vsub.f32 %v3211_v3, %v3232_v43  ;;  %v1275_v23 = vpop.f32.mrb[27].mxu1  ;;  %3249 = vmatmul.mubr.msk.f32.vlgmr.msra.gmra.mrb[18].mxu0 %vm239_vm0, %v1295_v41 }
 0x2fd   : > { %v1296_v25 = vsub.f32 %v1180_v4, %v1275_v23  ;;  %3687 = vmatpush3.bf16.msra.mxu0 %v3999_v2 }
 0x2fe   : > { %3689 = vmatprep.subr.bf16.mxu0 %v4014_v5 }
 0x2ff   : > { %v3235_v27 = vpop.f32.mrb[28].mxu1  ;;  %3251 = vmatprep.mubr.msk.f32.mxu0 %vm239_vm0, %v1296_v25 }
 0x300   : > { %v1299_v29 = vsub.f32 %v3214_v6, %v3235_v27  ;;  %v1285_v32 = vpop.f32.mrb[29].mxu1  ;;  %3252 = vmatmul.mubr.msk.f32.gmra.mrb[20].mxu0 %vm239_vm0, %v1297_v44 }
 0x301   : > { %v1298_v34 = vsub.f32 %v1190_v7, %v1285_v32  ;;  %3691 = vmatpush3.bf16.msra.mxu0 %v4014_v5 }
 0x302   : > { %3694 = vmatprep.subr.msk.bf16.mxu0 %vm4036_vm3, %v4030_v8 }
 0x303   : > { %3254 = vmatprep.mubr.msk.f32.mxu0 %vm239_vm0, %v1298_v34 }
 0x304   : > { %3255 = vmatmul.mubr.msk.f32.gmra.mrb[22].mxu0 %vm239_vm0, %v1299_v29 }
 0x305   : > { %3697 = vmatpush3.bf16.msk.msra.mxu0 %vm4036_vm3, %v4030_v8  ;;  %3269 = vmatprep.mubr.msk.f32.mxu0 %vm239_vm0, %v1075_v38 }
 0x306   : > { %3296 = vmatprep.subr.bf16.mxu0 %v3905_v46 }
 0x308   : > { %3270 = vmatmul.mubr.msk.f32.vlgmr.msra.gmra.mrb[18].mxu0 %vm239_vm0, %v3187_v37 }
 0x309   : > { %3272 = vmatprep.mubr.msk.f32.mxu0 %vm239_vm0, %v1085_v15 }
 0x30c   : > { %3273 = vmatmul.mubr.msk.f32.gmra.mrb[20].mxu0 %vm239_vm0, %v3190_v14 }
 0x30d   : > { %3275 = vmatprep.mubr.msk.f32.mxu0 %vm239_vm0, %v1095_v16 }
 0x310   : > { %3276 = vmatmul.mubr.msk.f32.gmra.mrb[22].mxu0 %vm239_vm0, %v3193_v40 }
 0x311   : > { %3302 = vmatprep.mubr.msk.bf16.mxu0 %vm3906_vm4, %v3905_v46 }
 0x3db   : > { %v3271_v17 = vpop.f32.mrb[18].mxu0 }
 0x3dc   : > { %v4342_v47 = vsub.f32 %v4050_v26, %v3271_v17  ;;  %v1497_v48 = vpop.f32.mrb[19].mxu0 }
 0x3dd   : > { %v4345_v49 = vsub.f32 %v4048_v24, %v1497_v48 }
 0x3de   : > { %v1539_v50 = vmul.f32 %v4342_v47, %v4342_v47 }
 0x3df   : > { %v1538_v51 = vmul.f32 %v4345_v49, %v4345_v49  ;;  %v3274_v52 = vpop.f32.mrb[20].mxu0 }
 0x3e0   : > { %v4352_v53 = vsub.f32 %v4056_v31, %v3274_v52  ;;  %v1507_v54 = vpop.f32.mrb[21].mxu0 }
 0x3e1   : > { %v1544_v55 = vpack.c.bf16 %v1539_v50, %v1538_v51  ;;  %v4355_v56 = vsub.f32 %v4052_v28, %v1507_v54 }
 0x3e2   : > { %v1541_v26 = vmul.f32 %v4352_v53, %v4352_v53 }
 0x3e3   : > { %v1540_v24 = vmul.f32 %v4355_v56, %v4355_v56  ;;  %v3277_v57 = vpop.f32.mrb[22].mxu0  ;;  %3279 = vmatpush3.bf16.msra.mxu1 %v1544_v55  ;;  %3297 = vmatpush3.bf16.msra.mxu0 %v1544_v55 }
 0x3e4   : > { %v1531_v58 = vsub.f32 %v4062_v35, %v3277_v57  ;;  %v1517_v59 = vpop.f32.mrb[23].mxu0  ;;  %3280 = vmatprep.subr.bf16.mxu1 %v3905_v46  ;;  %3298 = vmatprep.subr.bf16.mxu0 %v3905_v46 }
 0x3e5   : > { %v1545_v31 = vpack.c.bf16 %v1541_v26, %v1540_v24  ;;  %v4365_v28 = vsub.f32 %v4058_v33, %v1517_v59  ;;  %v4408_v33 = vsel %vm1556_vm5, %v4030_v8, 0 }
 0x3e6   : > { %v1543_v60 = vmul.f32 %v1531_v58, %v1531_v58 }
 0x3e7   : > { %v1542_v61 = vmul.f32 %v4365_v28, %v4365_v28  ;;  %3281 = vmatpush3.bf16.msra.mxu1 %v1545_v31  ;;  %3299 = vmatpush3.bf16.msra.mxu0 %v1545_v31 }
 0x3e8   : > { %3282 = vmatprep.subr.bf16.mxu1 %v3905_v46  ;;  %3300 = vmatprep.subr.bf16.mxu0 %v3905_v46 }
 0x3e9   : > { %v1546_v35 = vpack.c.bf16 %v1543_v60, %v1542_v61 }
 0x3eb   : > { %v1558_v62 = vsel %vm1556_vm5, %v1546_v35, 0 }
 0x3ec   : > { %3283 = vmatpush3.bf16.msra.mxu1 %v1558_v62  ;;  %3301 = vmatpush3.bf16.msra.mxu0 %v1558_v62 }
 0x3ed   : > { %3314 = vmatprep.subr.bf16.mxu1 %v3905_v46  ;;  %3332 = vmatprep.subr.bf16.mxu0 %v3905_v46 }
 0x3ef   : > { %3285 = vmatmul.mubr.msk.bf16.vlgmr.msra.gmra.mrb[32].mxu1 %vm239_vm0, %v3999_v2  ;;  %3303 = vmatmul.mubr.msk.bf16.vlgmr.msra.gmra.mrb[24].mxu0 %vm239_vm0, %v4092_v39 }
 0x3f0   : > { %3288 = vmatprep.mubr.msk.bf16.mxu1 %vm3906_vm4, %v3905_v46  ;;  %3306 = vmatprep.mubr.msk.bf16.mxu0 %vm3906_vm4, %v3905_v46 }
 0x3f1   : > { %3315 = vmatpush3.bf16.msra.mxu1 %v3999_v2  ;;  %3333 = vmatpush3.bf16.msra.mxu0 %v4092_v39 }
 0x3f2   : > { %3316 = vmatprep.subr.bf16.mxu1 %v3905_v46  ;;  %3334 = vmatprep.subr.bf16.mxu0 %v3905_v46 }
 0x3f5   : > { %3317 = vmatpush3.bf16.msra.mxu1 %v4014_v5  ;;  %3335 = vmatpush3.bf16.msra.mxu0 %v4112_v42 }
 0x3f6   : > { %3318 = vmatprep.subr.bf16.mxu1 %v3905_v46  ;;  %3336 = vmatprep.subr.bf16.mxu0 %v3905_v46 }
 0x3f7   : > { %3289 = vmatmul.mubr.msk.bf16.gmra.mrb[36].mxu1 %vm239_vm0, %v4014_v5  ;;  %3307 = vmatmul.mubr.msk.bf16.gmra.mrb[28].mxu0 %vm239_vm0, %v4112_v42 }
 0x3f8   : > { %3292 = vmatprep.mubr.msk.bf16.mxu1 %vm3906_vm4, %v3905_v46  ;;  %3310 = vmatprep.mubr.msk.bf16.mxu0 %vm3906_vm4, %v3905_v46 }
 0x3f9   : > { %3319 = vmatpush3.bf16.msra.mxu1 %v4408_v33  ;;  %3337 = vmatpush3.bf16.msra.mxu0 %v4412_v63 }
 0x3fa   : > { %3350 = vmatprep.subr.bf16.mxu1 %v3905_v46  ;;  %3386 = vmatprep.subr.bf16.mxu0 %v3905_v46 }
 0x3ff   : > { %3293 = vmatmul.mubr.msk.bf16.gmra.mrb[40].mxu1 %vm239_vm0, %v4030_v8  ;;  %3311 = vmatmul.mubr.msk.bf16.gmra.mrb[32].mxu0 %vm239_vm0, %v4132_v45 }
 0x400   : > { %3320 = vmatprep.mubr.msk.bf16.mxu1 %vm3906_vm4, %v3905_v46  ;;  %3338 = vmatprep.mubr.msk.bf16.mxu0 %vm3906_vm4, %v3905_v46 }
 0x4c2   : > { %v1594_v10 = vpop.f32.mrb[32].mxu1  ;;  %v1660_v11 = vpop.f32.mrb[24].mxu0 }
 0x4c3   : > { %v3286_v13 = vpop.f32.mrb[33].mxu1  ;;  %v3304_v0 = vpop.f32.mrb[25].mxu0 }
 0x4c4   : > { %v1597_v1 = vpop.f32.mrb[34].mxu1  ;;  %v1663_v3 = vpop.f32.mrb[26].mxu0 }
 0x4c5   : > { %v1683_v4 = vpack.c.bf16 %v1597_v1, %v1594_v10  ;;  %v1686_v6 = vpack.c.bf16 %v1663_v3, %v1660_v11  ;;  %v3287_v7 = vpop.f32.mrb[35].mxu1  ;;  %v3305_v37 = vpop.f32.mrb[27].mxu0 }
 0x4c7   : > { %3321 = vmatmul.mubr.msk.bf16.vlgmr.msra.gmra.mrb[44].mxu1 %vm239_vm0, %v1683_v4  ;;  %3339 = vmatmul.mubr.msk.bf16.vlgmr.msra.gmra.mrb[36].mxu0 %vm239_vm0, %v1686_v6 }
 0x4c8   : > { %3351 = vmatpush3.bf16.msra.mxu1 %v3999_v2  ;;  %3324 = vmatprep.mubr.msk.bf16.mxu1 %vm3906_vm4, %v3905_v46 }
 0x4c9   : > { %3342 = vmatprep.mubr.msk.bf16.mxu0 %vm3906_vm4, %v3905_v46  ;;  %3352 = vmatprep.subr.bf16.mxu1 %v3905_v46 }
 0x4ca   : > { %v1602_v38 = vpop.f32.mrb[36].mxu1  ;;  %v1668_v14 = vpop.f32.mrb[28].mxu0 }
 0x4cb   : > { %v3290_v15 = vpop.f32.mrb[37].mxu1  ;;  %v3308_v40 = vpop.f32.mrb[29].mxu0 }
 0x4cc   : > { %v1605_v16 = vpop.f32.mrb[38].mxu1  ;;  %v1671_v19 = vpop.f32.mrb[30].mxu0  ;;  %3353 = vmatpush3.bf16.msra.mxu1 %v4014_v5 }
 0x4cd   : > { %v1684_v41 = vpack.c.bf16 %v1605_v16, %v1602_v38  ;;  %v1687_v20 = vpack.c.bf16 %v1671_v19, %v1668_v14  ;;  %v3291_v22 = vpop.f32.mrb[39].mxu1  ;;  %v3309_v43 = vpop.f32.mrb[31].mxu0  ;;  %3354 = vmatprep.subr.bf16.mxu1 %v3905_v46 }
 0x4cf   : > { %3325 = vmatmul.mubr.msk.bf16.gmra.mrb[48].mxu1 %vm239_vm0, %v1684_v41  ;;  %3343 = vmatmul.mubr.msk.bf16.gmra.mrb[40].mxu0 %vm239_vm0, %v1687_v20 }
 0x4d0   : > { %3328 = vmatprep.mubr.msk.bf16.mxu1 %vm3906_vm4, %v3905_v46  ;;  %3346 = vmatprep.mubr.msk.bf16.mxu0 %vm3906_vm4, %v3905_v46 }
 0x4d1   : > { %3355 = vmatpush3.bf16.msra.mxu1 %v4408_v33 }
 0x4d2   : > { %v1610_v44 = vpop.f32.mrb[40].mxu1  ;;  %v1676_v23 = vpop.f32.mrb[32].mxu0  ;;  %3368 = vmatprep.subr.bf16.mxu1 %v3905_v46 }
 0x4d3   : > { %v3294_v25 = vpop.f32.mrb[41].mxu1  ;;  %v3312_v27 = vpop.f32.mrb[33].mxu0 }
 0x4d4   : > { %v1613_v29 = vpop.f32.mrb[42].mxu1  ;;  %v1679_v32 = vpop.f32.mrb[34].mxu0 }
 0x4d5   : > { %v1685_v34 = vpack.c.bf16 %v1613_v29, %v1610_v44  ;;  %v1688_v17 = vpack.c.bf16 %v1679_v32, %v1676_v23  ;;  %v3295_v48 = vpop.f32.mrb[43].mxu1  ;;  %v3313_v50 = vpop.f32.mrb[35].mxu0 }
 0x4d7   : > { %3329 = vmatmul.mubr.msk.bf16.gmra.mrb[52].mxu1 %vm239_vm0, %v1685_v34  ;;  %3347 = vmatmul.mubr.msk.bf16.gmra.mrb[44].mxu0 %vm239_vm0, %v1688_v17 }
 0x4d8   : > { %3356 = vmatprep.mubr.msk.bf16.mxu1 %vm3906_vm4, %v3905_v46  ;;  %3392 = vmatprep.mubr.msk.bf16.mxu0 %vm3906_vm4, %v3905_v46 }
 0x4df   : > { %3357 = vmatmul.mubr.msk.bf16.vlgmr.msra.gmra.mrb[56].mxu1 %vm239_vm0, %v1686_v6 }
 0x4e0   : > { %3369 = vmatpush3.bf16.msra.mxu1 %v4092_v39  ;;  %3360 = vmatprep.mubr.msk.bf16.mxu1 %vm3906_vm4, %v3905_v46 }
 0x4e1   : > { %3370 = vmatprep.subr.bf16.mxu1 %v3905_v46 }
 0x4e4   : > { %3371 = vmatpush3.bf16.msra.mxu1 %v4112_v42 }
 0x4e5   : > { %3372 = vmatprep.subr.bf16.mxu1 %v3905_v46 }
 0x4e7   : > { %3361 = vmatmul.mubr.msk.bf16.gmra.mrb[60].mxu1 %vm239_vm0, %v1687_v20 }
 0x4e8   : > { %3364 = vmatprep.mubr.msk.bf16.mxu1 %vm3906_vm4, %v3905_v46  ;;  %3373 = vmatpush3.bf16.msra.mxu1 %v4412_v63 }
 0x4e9   : > { %3422 = vmatprep.subr.bf16.mxu1 %v3905_v46 }
 0x4ef   : > { %3365 = vmatmul.mubr.msk.bf16.gmra.mrb[64].mxu1 %vm239_vm0, %v1688_v17 }
 0x4f0   : > { %3374 = vmatprep.mubr.msk.bf16.mxu1 %vm3906_vm4, %v3905_v46 }
 0x4f7   : > { %3375 = vmatmul.mubr.msk.bf16.vlgmr.msra.gmra.mrb[56].mxu1 %vm239_vm0, %v1683_v4 }
 0x4f8   : > { %3378 = vmatprep.mubr.msk.bf16.mxu1 %vm3906_vm4, %v3905_v46 }
 0x4ff   : > { %3379 = vmatmul.mubr.msk.bf16.gmra.mrb[60].mxu1 %vm239_vm0, %v1684_v41 }
 0x500   : > { %3382 = vmatprep.mubr.msk.bf16.mxu1 %vm3906_vm4, %v3905_v46 }
 0x507   : > { %3383 = vmatmul.mubr.msk.bf16.gmra.mrb[64].mxu1 %vm239_vm0, %v1685_v34 }
 0x508   : > { %3428 = vmatprep.mubr.msk.bf16.mxu1 %vm3906_vm4, %v3905_v46 }
 0x59a   : > { %v1734_v51 = vpop.f32.mrb[44].mxu1  ;;  %v1802_v52 = vpop.f32.mrb[36].mxu0 }
 0x59b   : > { %v1825_v54 = vsub.f32 %v1734_v51, %v1802_v52  ;;  %v3322_v55 = vpop.f32.mrb[45].mxu1  ;;  %v3340_v26 = vpop.f32.mrb[37].mxu0 }
 0x59c   : > { %v1737_v24 = vpop.f32.mrb[46].mxu1  ;;  %v1805_v57 = vpop.f32.mrb[38].mxu0 }
 0x59d   : > { %v1826_v58 = vsub.f32 %v1737_v24, %v1805_v57  ;;  %v3323_v59 = vpop.f32.mrb[47].mxu1  ;;  %v3341_v31 = vpop.f32.mrb[39].mxu0  ;;  %v1945_v60 = vmul.f32 %v1825_v54, %v4203_v12 }
 0x59f   : > { %v1946_v61 = vmul.f32 %v1826_v58, %v4198_v9 }
 0x5a1   : > { %v4468_v35 = vpack.c.bf16 %v1946_v61, %v1945_v60 }
 0x5a2   : > { %v1742_v62 = vpop.f32.mrb[48].mxu1  ;;  %v1810_v10 = vpop.f32.mrb[40].mxu0 }
 0x5a3   : > { %v1827_v11 = vsub.f32 %v1742_v62, %v1810_v10  ;;  %v3326_v13 = vpop.f32.mrb[49].mxu1  ;;  %v3344_v0 = vpop.f32.mrb[41].mxu0 }
 0x5a4   : > { %v1745_v1 = vpop.f32.mrb[50].mxu1  ;;  %v1813_v3 = vpop.f32.mrb[42].mxu0 }
 0x5a5   : > { %v1828_v4 = vsub.f32 %v1745_v1, %v1813_v3  ;;  %v3327_v6 = vpop.f32.mrb[51].mxu1  ;;  %v3345_v7 = vpop.f32.mrb[43].mxu0  ;;  %v1947_v37 = vmul.f32 %v1827_v11, %v4215_v21 }
 0x5a7   : > { %v1948_v38 = vmul.f32 %v1828_v4, %v4210_v18 }
 0x5a9   : > { %v4472_v14 = vpack.c.bf16 %v1948_v38, %v1947_v37 }
 0x5aa   : > { %v1750_v15 = vpop.f32.mrb[52].mxu1  ;;  %v1818_v40 = vpop.f32.mrb[44].mxu0 }
 0x5ab   : > { %v1829_v16 = vsub.f32 %v1750_v15, %v1818_v40  ;;  %v3330_v19 = vpop.f32.mrb[53].mxu1  ;;  %v3348_v41 = vpop.f32.mrb[45].mxu0 }
 0x5ac   : > { %v1753_v20 = vpop.f32.mrb[54].mxu1  ;;  %v1821_v22 = vpop.f32.mrb[46].mxu0 }
 0x5ad   : > { %v1830_v43 = vsub.f32 %v1753_v20, %v1821_v22  ;;  %v3331_v44 = vpop.f32.mrb[55].mxu1  ;;  %v3349_v23 = vpop.f32.mrb[47].mxu0  ;;  %v1949_v25 = vmul.f32 %v1829_v16, %v4229_v36 }
 0x5af   : > { %v1950_v27 = vmul.f32 %v1830_v43, %v4224_v30 }
 0x5b1   : > { %v1953_v29 = vpack.c.bf16 %v1950_v27, %v1949_v25 }
 0x5ca   : > { %v1922_v32 = vpop.f32.mrb[56].mxu1 }
 0x5cb   : > { %v3376_v34 = vpop.f32.mrb[57].mxu1  ;;  %v1954_v48 = vmul.f32 %v1922_v32, %v4203_v12 }
 0x5cc   : > { %v1925_v17 = vpop.f32.mrb[58].mxu1 }
 0x5cd   : > { %v1955_v50 = vmul.f32 %v1925_v17, %v4198_v9  ;;  %v3377_v51 = vpop.f32.mrb[59].mxu1 }
 0x5cf   : > { %v1960_v52 = vpack.c.bf16 %v1955_v50, %v1954_v48 }
 0x5d1   : > { %3387 = vmatpush3.bf16.msra.mxu0 %v1960_v52  ;;  %3423 = vmatpush3.bf16.msra.mxu1 %v1960_v52 }
 0x5d2   : > { %v1930_v54 = vpop.f32.mrb[60].mxu1  ;;  %3388 = vmatprep.subr.bf16.mxu0 %v3905_v46  ;;  %3424 = vmatprep.subr.bf16.mxu1 %v3905_v46 }
 0x5d3   : > { %v3380_v55 = vpop.f32.mrb[61].mxu1  ;;  %v1956_v24 = vmul.f32 %v1930_v54, %v4215_v21 }
 0x5d4   : > { %v1933_v26 = vpop.f32.mrb[62].mxu1 }
 0x5d5   : > { %v1957_v57 = vmul.f32 %v1933_v26, %v4210_v18  ;;  %v3381_v58 = vpop.f32.mrb[63].mxu1  ;;  %v2024_v18 = vsel %vm1556_vm5, %v1953_v29, 0 }
 0x5d7   : > { %v1961_v59 = vpack.c.bf16 %v1957_v57, %v1956_v24 }
 0x5d9   : > { %3389 = vmatpush3.bf16.msra.mxu0 %v1961_v59  ;;  %3425 = vmatpush3.bf16.msra.mxu1 %v1961_v59 }
 0x5da   : > { %v1938_v9 = vpop.f32.mrb[64].mxu1  ;;  %3390 = vmatprep.subr.bf16.mxu0 %v3905_v46  ;;  %3426 = vmatprep.subr.bf16.mxu1 %v3905_v46 }
 0x5db   : > { %v3384_v12 = vpop.f32.mrb[65].mxu1  ;;  %v1958_v60 = vmul.f32 %v1938_v9, %v4229_v36 }
 0x5dc   : > { %v1941_v31 = vpop.f32.mrb[66].mxu1 }
 0x5dd   : > { %v1959_v61 = vmul.f32 %v1941_v31, %v4224_v30  ;;  %v3385_v62 = vpop.f32.mrb[67].mxu1 }
 0x5df   : > { %v1962_v10 = vpack.c.bf16 %v1959_v61, %v1958_v60 }
 0x5e1   : > { %v1964_v21 = vsel %vm1556_vm5, %v1962_v10, 0 }
 0x5e2   : > { %3391 = vmatpush3.bf16.msra.mxu0 %v1964_v21  ;;  %3427 = vmatpush3.bf16.msra.mxu1 %v1964_v21 }
 0x5e3   : > { %3404 = vmatprep.subr.bf16.mxu0 %v3905_v46  ;;  %3458 = vmatprep.subr.bf16.mxu1 %v3905_v46 }
 0x5e5   : > { %3393 = vmatmul.mubr.msk.bf16.vlgmr.msra.gmra.mrb[48].mxu0 %vm239_vm0, %v4092_v39  ;;  %3429 = vmatmul.mubr.msk.bf16.vlgmr.msra.gmra.mrb[68].mxu1 %vm239_vm0, %v3999_v2 }
 0x5e6   : > { %3405 = vmatpush3.bf16.msra.mxu0 %v4468_v35  ;;  %3396 = vmatprep.mubr.msk.bf16.mxu0 %vm3906_vm4, %v3905_v46 }
 0x5e7   : > { %3406 = vmatprep.subr.bf16.mxu0 %v3905_v46  ;;  %3432 = vmatprep.mubr.msk.bf16.mxu1 %vm3906_vm4, %v3905_v46 }
 0x5e8   : > { %3459 = vmatpush3.bf16.msra.mxu1 %v4092_v39 }
 0x5e9   : > { %3460 = vmatprep.subr.bf16.mxu1 %v3905_v46 }
 0x5ea   : > { %3407 = vmatpush3.bf16.msra.mxu0 %v4472_v14 }
 0x5eb   : > { %3408 = vmatprep.subr.bf16.mxu0 %v3905_v46 }
 0x5ec   : > { %3461 = vmatpush3.bf16.msra.mxu1 %v4112_v42 }
 0x5ed   : > { %3397 = vmatmul.mubr.msk.bf16.gmra.mrb[52].mxu0 %vm239_vm0, %v4112_v42  ;;  %3433 = vmatmul.mubr.msk.bf16.gmra.mrb[72].mxu1 %vm239_vm0, %v4014_v5 }
 0x5ee   : > { %3409 = vmatpush3.bf16.msra.mxu0 %v2024_v18  ;;  %3400 = vmatprep.mubr.msk.bf16.mxu0 %vm3906_vm4, %v3905_v46 }
 0x5ef   : > { %3440 = vmatprep.subr.bf16.mxu0 %v3905_v46  ;;  %3436 = vmatprep.mubr.msk.bf16.mxu1 %vm3906_vm4, %v3905_v46 }
 0x5f0   : > { %3462 = vmatprep.subr.bf16.mxu1 %v3905_v46 }
 0x5f1   : > { %3463 = vmatpush3.bf16.msra.mxu1 %v4412_v63 }
 0x5f2   : > { %3476 = vmatprep.subr.bf16.mxu1 %v3905_v46 }
 0x5f5   : > { %3401 = vmatmul.mubr.msk.bf16.gmra.mrb[56].mxu0 %vm239_vm0, %v4132_v45  ;;  %3437 = vmatmul.mubr.msk.bf16.gmra.mrb[76].mxu1 %vm239_vm0, %v4030_v8 }
 0x5f6   : > { %3410 = vmatprep.mubr.msk.bf16.mxu0 %vm3906_vm4, %v3905_v46  ;;  %3464 = vmatprep.mubr.msk.bf16.mxu1 %vm3906_vm4, %v3905_v46 }
 0x5fd   : > { %3411 = vmatmul.mubr.msk.bf16.vlgmr.msra.gmra.mrb[48].mxu0 %vm239_vm0, %v3999_v2 }
 0x5fe   : > { %3441 = vmatpush3.bf16.msra.mxu0 %v4468_v35  ;;  %3414 = vmatprep.mubr.msk.bf16.mxu0 %vm3906_vm4, %v3905_v46 }
 0x5ff   : > { %3442 = vmatprep.subr.bf16.mxu0 %v3905_v46 }
 0x602   : > { %3443 = vmatpush3.bf16.msra.mxu0 %v4472_v14 }
 0x603   : > { %3444 = vmatprep.subr.bf16.mxu0 %v3905_v46 }
 0x605   : > { %3415 = vmatmul.mubr.msk.bf16.gmra.mrb[52].mxu0 %vm239_vm0, %v4014_v5 }
 0x606   : > { %3445 = vmatpush3.bf16.msra.mxu0 %v2024_v18  ;;  %3418 = vmatprep.mubr.msk.bf16.mxu0 %vm3906_vm4, %v3905_v46 }
 0x607   : > { %3494 = vmatprep.subr.bf16.mxu0 %v3905_v46 }
 0x60d   : > { %3419 = vmatmul.mubr.msk.bf16.gmra.mrb[56].mxu0 %vm239_vm0, %v4030_v8 }
 0x60e   : > { %3446 = vmatprep.mubr.msk.bf16.mxu0 %vm3906_vm4, %v3905_v46 }
 0x615   : > { %3447 = vmatmul.mubr.msk.bf16.vlgmr.msra.gmra.mrb[60].mxu0 %vm239_vm0, %v4092_v39 }
 0x616   : > { %3450 = vmatprep.mubr.msk.bf16.mxu0 %vm3906_vm4, %v3905_v46  ;;  %3495 = vmatpush3.bf16.msra.mxu0 %v3999_v2 }
 0x617   : > { %3496 = vmatprep.subr.bf16.mxu0 %v3905_v46 }
 0x61a   : > { %3497 = vmatpush3.bf16.msra.mxu0 %v4014_v5 }
 0x61b   : > { %3498 = vmatprep.subr.bf16.mxu0 %v3905_v46 }
 0x61d   : > { %3451 = vmatmul.mubr.msk.bf16.gmra.mrb[64].mxu0 %vm239_vm0, %v4112_v42 }
 0x61e   : > { %3454 = vmatprep.mubr.msk.bf16.mxu0 %vm3906_vm4, %v3905_v46  ;;  %3499 = vmatpush3.bf16.msra.mxu0 %v4408_v33 }
 0x61f   : > { %3512 = vmatprep.subr.bf16.mxu0 %v3905_v46 }
 0x625   : > { %3455 = vmatmul.mubr.msk.bf16.gmra.mrb[68].mxu0 %vm239_vm0, %v4132_v45 }
 0x626   : > { %3500 = vmatprep.mubr.msk.bf16.mxu0 %vm3906_vm4, %v3905_v46 }
 0x6b8   : > { %v2117_v8 = vpop.f32.mrb[68].mxu1 }
 0x6b9   : > { %v3430_v30 = vpop.f32.mrb[69].mxu1 }
 0x6ba   : > { %v2120_v36 = vpop.f32.mrb[70].mxu1 }
 0x6bb   : > { %v3431_v35 = vpop.f32.mrb[71].mxu1 }
 0x6c0   : > { %v2125_v11 = vpop.f32.mrb[72].mxu1 }
 0x6c1   : > { %v3434_v13 = vpop.f32.mrb[73].mxu1 }
 0x6c2   : > { %v2128_v0 = vpop.f32.mrb[74].mxu1 }
 0x6c3   : > { %v3435_v1 = vpop.f32.mrb[75].mxu1 }
 0x6c8   : > { %v2133_v3 = vpop.f32.mrb[76].mxu1 }
 0x6c9   : > { %v3438_v4 = vpop.f32.mrb[77].mxu1 }
 0x6ca   : > { %v2136_v6 = vpop.f32.mrb[78].mxu1 }
 0x6cb   : > { %v3439_v7 = vpop.f32.mrb[79].mxu1 }
 0x6d0   : > { %v2060_v37 = vpop.f32.mrb[48].mxu0 }
 0x6d1   : > { %v3412_v38 = vpop.f32.mrb[49].mxu0 }
 0x6d2   : > { %v2063_v14 = vpop.f32.mrb[50].mxu0 }
 0x6d3   : > { %v2203_v15 = vpack.c.bf16 %v2063_v14, %v2060_v37  ;;  %v3413_v45 = vpop.f32.mrb[51].mxu0 }
 0x6d8   : > { %v2068_v40 = vpop.f32.mrb[52].mxu0 }
 0x6d9   : > { %v3416_v16 = vpop.f32.mrb[53].mxu0 }
 0x6da   : > { %v2071_v19 = vpop.f32.mrb[54].mxu0 }
 0x6db   : > { %v2204_v41 = vpack.c.bf16 %v2071_v19, %v2068_v40  ;;  %v3417_v20 = vpop.f32.mrb[55].mxu0 }
 0x6e0   : > { %v2076_v22 = vpop.f32.mrb[56].mxu0 }
 0x6e1   : > { %v3420_v43 = vpop.f32.mrb[57].mxu0 }
 0x6e2   : > { %v2079_v44 = vpop.f32.mrb[58].mxu0 }
 0x6e3   : > { %v2205_v23 = vpack.c.bf16 %v2079_v44, %v2076_v22  ;;  %v3421_v25 = vpop.f32.mrb[59].mxu0 }
 0x6e8   : > { %v2174_v27 = vpop.f32.mrb[60].mxu0 }
 0x6e9   : > { %v2197_v29 = vsub.f32 %v2117_v8, %v2174_v27  ;;  %v3448_v32 = vpop.f32.mrb[61].mxu0 }
 0x6ea   : > { %v2177_v34 = vpop.f32.mrb[62].mxu0 }
 0x6eb   : > { %v2198_v17 = vsub.f32 %v2120_v36, %v2177_v34  ;;  %v3449_v48 = vpop.f32.mrb[63].mxu0 }
 0x6ed   : > { %v2206_v50 = vpack.c.bf16 %v2198_v17, %v2197_v29 }
 0x6ef   : > { %3465 = vmatmul.mubr.msk.bf16.vlgmr.msra.gmra.mrb[80].mxu1 %vm239_vm0, %v2206_v50  ;;  %3501 = vmatmul.mubr.msk.bf16.vlgmr.msra.gmra.mrb[72].mxu0 %vm239_vm0, %v2206_v50 }
 0x6f0   : > { %v2182_v51 = vpop.f32.mrb[64].mxu0  ;;  %3513 = vmatpush3.bf16.msra.mxu0 %v4092_v39  ;;  %3468 = vmatprep.mubr.msk.bf16.mxu1 %vm3906_vm4, %v3905_v46 }
 0x6f1   : > { %v2199_v52 = vsub.f32 %v2125_v11, %v2182_v51  ;;  %v3452_v54 = vpop.f32.mrb[65].mxu0  ;;  %3477 = vmatpush3.bf16.msra.mxu1 %v3999_v2  ;;  %3504 = vmatprep.mubr.msk.bf16.mxu0 %vm3906_vm4, %v3905_v46 }
 0x6f2   : > { %v2185_v55 = vpop.f32.mrb[66].mxu0  ;;  %3514 = vmatprep.subr.bf16.mxu0 %v3905_v46  ;;  %3478 = vmatprep.subr.bf16.mxu1 %v3905_v46 }
 0x6f3   : > { %v2200_v26 = vsub.f32 %v2128_v0, %v2185_v55  ;;  %v3453_v24 = vpop.f32.mrb[67].mxu0 }
 0x6f4   : > { %3515 = vmatpush3.bf16.msra.mxu0 %v4112_v42 }
 0x6f5   : > { %v2207_v39 = vpack.c.bf16 %v2200_v26, %v2199_v52  ;;  %3479 = vmatpush3.bf16.msra.mxu1 %v4014_v5  ;;  %3516 = vmatprep.subr.bf16.mxu0 %v3905_v46 }
 0x6f6   : > { %3480 = vmatprep.subr.bf16.mxu1 %v3905_v46 }
 0x6f7   : > { %3469 = vmatmul.mubr.msk.bf16.gmra.mrb[84].mxu1 %vm239_vm0, %v2207_v39  ;;  %3505 = vmatmul.mubr.msk.bf16.gmra.mrb[76].mxu0 %vm239_vm0, %v2207_v39 }
 0x6f8   : > { %v2190_v2 = vpop.f32.mrb[68].mxu0  ;;  %3472 = vmatprep.mubr.msk.bf16.mxu1 %vm3906_vm4, %v3905_v46  ;;  %3508 = vmatprep.mubr.msk.bf16.mxu0 %vm3906_vm4, %v3905_v46 }
 0x6f9   : > { %v2201_v57 = vsub.f32 %v2133_v3, %v2190_v2  ;;  %v3456_v42 = vpop.f32.mrb[69].mxu0  ;;  %3481 = vmatpush3.bf16.msra.mxu1 %v4408_v33  ;;  %3517 = vmatpush3.bf16.msra.mxu0 %v4412_v63 }
 0x6fa   : > { %v2193_v5 = vpop.f32.mrb[70].mxu0 }
 0x6fb   : > { %v2202_v58 = vsub.f32 %v2136_v6, %v2193_v5  ;;  %v3457_v59 = vpop.f32.mrb[71].mxu0 }
 0x6fd   : > { %v2208_v9 = vpack.c.bf16 %v2202_v58, %v2201_v57 }
 0x6ff   : > { %3473 = vmatmul.mubr.msk.bf16.gmra.mrb[88].mxu1 %vm239_vm0, %v2208_v9  ;;  %3509 = vmatmul.mubr.msk.bf16.gmra.mrb[80].mxu0 %vm239_vm0, %v2208_v9 }
 0x700   : > { %3482 = vmatprep.mubr.msk.bf16.mxu1 %vm3906_vm4, %v3905_v46  ;;  %3518 = vmatprep.mubr.msk.bf16.mxu0 %vm3906_vm4, %v3905_v46 }
 0x707   : > { %3483 = vmatmul.mubr.msk.bf16.vlgmr.msra.gmra.mrb[80].mxu1 %vm239_vm0, %v2203_v15  ;;  %3519 = vmatmul.mubr.msk.bf16.vlgmr.msra.gmra.mrb[84].mxu0 %vm239_vm0, %v2203_v15 }
 0x708   : > { %3486 = vmatprep.mubr.msk.bf16.mxu1 %vm3906_vm4, %v3905_v46  ;;  %3522 = vmatprep.mubr.msk.bf16.mxu0 %vm3906_vm4, %v3905_v46 }
 0x70f   : > { %3487 = vmatmul.mubr.msk.bf16.gmra.mrb[84].mxu1 %vm239_vm0, %v2204_v41  ;;  %3523 = vmatmul.mubr.msk.bf16.gmra.mrb[88].mxu0 %vm239_vm0, %v2204_v41 }
 0x710   : > { %3490 = vmatprep.mubr.msk.bf16.mxu1 %vm3906_vm4, %v3905_v46  ;;  %3526 = vmatprep.mubr.msk.bf16.mxu0 %vm3906_vm4, %v3905_v46 }
 0x717   : > { %3491 = vmatmul.mubr.msk.bf16.gmra.mrb[88].mxu1 %vm239_vm0, %v2205_v23  ;;  %3527 = vmatmul.mubr.msk.bf16.gmra.mrb[92].mxu0 %vm239_vm0, %v2205_v23 }
 0x7c2   : > { %v2373_v33 = vpop.f32.mrb[72].mxu0 }
 0x7c3   : > { %v3502_v63 = vpop.f32.mrb[73].mxu0 }
 0x7c4   : > { %v2376_v12 = vpop.f32.mrb[74].mxu0 }
 0x7c5   : > { %v3503_v31 = vpop.f32.mrb[75].mxu0 }
 0x7ca   : > { %v2381_v60 = vpop.f32.mrb[76].mxu0 }
 0x7cb   : > { %v3506_v61 = vpop.f32.mrb[77].mxu0 }
 0x7cc   : > { %v2384_v62 = vpop.f32.mrb[78].mxu0 }
 0x7cd   : > { %v3507_v10 = vpop.f32.mrb[79].mxu0 }
 0x7d2   : > { %v2389_v21 = vpop.f32.mrb[80].mxu0 }
 0x7d3   : > { %v3510_v18 = vpop.f32.mrb[81].mxu0 }
 0x7d4   : > { %v2392_v8 = vpop.f32.mrb[82].mxu0 }
 0x7d5   : > { %v3511_v30 = vpop.f32.mrb[83].mxu0 }
 0x7da   : > { %v2317_v36 = vpop.f32.mrb[80].mxu1  ;;  %v2429_v35 = vpop.f32.mrb[84].mxu0 }
 0x7db   : > { %v2451_v11 = vsub.f32 %v2373_v33, %v2429_v35  ;;  %v3484_v46 = vpop.f32.mrb[81].mxu1  ;;  %v3520_v13 = vpop.f32.mrb[85].mxu0  ;;  %v2456_v3 = vmul.f32 %v2317_v36, %v2317_v36 }
 0x7dc   : > { %v2320_v0 = vpop.f32.mrb[82].mxu1  ;;  %v2432_v1 = vpop.f32.mrb[86].mxu0 }
 0x7dd   : > { %v2461_v4 = vmul.f32 %v2451_v11, %v2451_v11  ;;  %v2452_v6 = vsub.f32 %v2376_v12, %v2432_v1  ;;  %v3485_v7 = vpop.f32.mrb[83].mxu1  ;;  %v3521_v37 = vpop.f32.mrb[87].mxu0  ;;  %v2457_v15 = vmul.f32 %v2320_v0, %v2320_v0 }
 0x7df   : > { %v2466_v38 = vadd.f32 %v2461_v4, %v2456_v3  ;;  %v2462_v14 = vmul.f32 %v2452_v6, %v2452_v6 }
 0x7e1   : > { %3810 = vrsqrt.f32 %v2466_v38  ;;  %v2467_v45 = vadd.f32 %v2462_v14, %v2457_v15  ;;  %vm2473_vm6 = vcmp.eq.f32.partialorder %v2466_v38, inf  ;;  %v2476_v57 = vand.u32 2147483648, %v2466_v38 }
 0x7e2   : > { %v2325_v40 = vpop.f32.mrb[84].mxu1  ;;  %v2437_v16 = vpop.f32.mrb[88].mxu0  ;;  %vm2475_vm7 = vcmp.eq.f32.partialorder %v2466_v38, 0.0 }
 0x7e3   : > { %v2453_v19 = vsub.f32 %v2381_v60, %v2437_v16  ;;  %v3488_v41 = vpop.f32.mrb[85].mxu1  ;;  %v3524_v20 = vpop.f32.mrb[89].mxu0  ;;  %3812 = vrsqrt.f32 %v2467_v45  ;;  %v2458_v44 = vmul.f32 %v2325_v40, %v2325_v40  ;;  %vm2480_vm8 = vcmp.eq.f32.partialorder %v2467_v45, inf }
 0x7e4   : > { %v2328_v22 = vpop.f32.mrb[86].mxu1  ;;  %v2440_v43 = vpop.f32.mrb[90].mxu0  ;;  %v2483_v60 = vand.u32 2147483648, %v2467_v45  ;;  %vm2482_vm9 = vcmp.eq.f32.partialorder %v2467_v45, 0.0 }
 0x7e5   : > { %v2463_v23 = vmul.f32 %v2453_v19, %v2453_v19  ;;  %v2454_v25 = vsub.f32 %v2384_v62, %v2440_v43  ;;  %v3489_v27 = vpop.f32.mrb[87].mxu1  ;;  %v3525_v29 = vpop.f32.mrb[91].mxu0  ;;  %v2459_v17 = vmul.f32 %v2328_v22, %v2328_v22 }
 0x7e7   : > { %v2468_v32 = vadd.f32 %v2463_v23, %v2458_v44  ;;  %v2464_v34 = vmul.f32 %v2454_v25, %v2454_v25 }
 0x7e9   : > { %3814 = vrsqrt.f32 %v2468_v32  ;;  %v2469_v48 = vadd.f32 %v2464_v34, %v2459_v17  ;;  %vm2487_vm10 = vcmp.eq.f32.partialorder %v2468_v32, inf  ;;  %v2490_v18 = vand.u32 2147483648, %v2468_v32 }
 0x7ea   : > { %v2333_v50 = vpop.f32.mrb[88].mxu1  ;;  %v2445_v51 = vpop.f32.mrb[92].mxu0  ;;  %vm2489_vm11 = vcmp.eq.f32.partialorder %v2468_v32, 0.0 }
 0x7eb   : > { %v3811_v52 = vpop.eup %3810  ;;  %v2455_v54 = vsub.f32 %v2389_v21, %v2445_v51  ;;  %v3492_v55 = vpop.f32.mrb[89].mxu1  ;;  %3816 = vrsqrt.f32 %v2469_v48  ;;  %v2460_v42 = vmul.f32 %v2333_v50, %v2333_v50  ;;  %vm2494_vm12 = vcmp.eq.f32.partialorder %v2469_v48, inf }
 0x7ec   : > { %v3528_v26 = vpop.f32.mrb[93].mxu0  ;;  %v2472_v24 = vmul.f32 %v3811_v52, %v2466_v38  ;;  %v2336_v39 = vpop.f32.mrb[90].mxu1  ;;  %v2497_v11 = vand.u32 2147483648, %v2469_v48  ;;  %vm2496_vm13 = vcmp.eq.f32.partialorder %v2469_v48, 0.0 }
 0x7ed   : > { %v2448_v2 = vpop.f32.mrb[94].mxu0  ;;  %v2465_v5 = vmul.f32 %v2455_v54, %v2455_v54  ;;  %v3493_v58 = vpop.f32.mrb[91].mxu1 }
 0x7ee   : > { %v3529_v59 = vpop.f32.mrb[95].mxu0  ;;  %v3813_v9 = vpop.eup %3812  ;;  %v2474_v33 = vsel %vm2473_vm6, %v2466_v38, %v2472_v24 }
 0x7ef   : > { %v2477_v63 = vsel %vm2475_vm7, %v2476_v57, %v2474_v33  ;;  %v2479_v12 = vmul.f32 %v3813_v9, %v2467_v45  ;;  %v2470_v31 = vadd.f32 %v2465_v5, %v2460_v42 }
 0x7f0   : > { %3818 = vrsqrt.f32 %v2477_v63  ;;  %vm2508_vm14 = vcmp.eq.f32.partialorder %v2477_v63, inf  ;;  %v2511_v6 = vand.u32 2147483648, %v2477_v63  ;;  %vm2510_vm0 = vcmp.eq.f32.partialorder %v2477_v63, 0.0 }
 0x7f1   : > { %v2481_v61 = vsel %vm2480_vm8, %v2467_v45, %v2479_v12  ;;  %3820 = vrsqrt.f32 %v2470_v31  ;;  %vm2501_vm15 = vcmp.eq.f32.partialorder %v2470_v31, inf  ;;  %v2504_v37 = vand.u32 2147483648, %v2470_v31 }
 0x7f2   : > { %v2484_v62 = vsel %vm2482_vm9, %v2483_v60, %v2481_v61  ;;  %vm2503_vm1 = vcmp.eq.f32.partialorder %v2470_v31, 0.0 }
 0x7f3   : > { %v3815_v10 = vpop.eup %3814  ;;  %3822 = vrsqrt.f32 %v2484_v62  ;;  %vm2515_vm2 = vcmp.eq.f32.partialorder %v2484_v62, inf  ;;  %v2518_v19 = vand.u32 2147483648, %v2484_v62  ;;  %vm2517_vm3 = vcmp.eq.f32.partialorder %v2484_v62, 0.0 }
 0x7f4   : > { %v2486_v21 = vmul.f32 %v3815_v10, %v2468_v32 }
 0x7f5   : > { %v3817_v8 = vpop.eup %3816 }
 0x7f6   : > { %v2488_v30 = vsel %vm2487_vm10, %v2468_v32, %v2486_v21  ;;  %v2493_v35 = vmul.f32 %v3817_v8, %v2469_v48  ;;  %vm2576_vm10 = vcmask 261125  }
 0x7f7   : > { %v2491_v36 = vsel %vm2489_vm11, %v2490_v18, %v2488_v30  ;;  %vm2578_vm11 = vcmask 261120  }
 0x7f8   : > { %3824 = vrsqrt.f32 %v2491_v36  ;;  %v2495_v46 = vsel %vm2494_vm12, %v2469_v48, %v2493_v35  ;;  %vm2522_vm4 = vcmp.eq.f32.partialorder %v2491_v36, inf  ;;  %v2525_v23 = vand.u32 2147483648, %v2491_v36 }
 0x7f9   : > { %v2498_v0 = vsel %vm2496_vm13, %v2497_v11, %v2495_v46  ;;  %vm2524_vm5 = vcmp.eq.f32.partialorder %v2491_v36, 0.0  ;;  %vm2582_vm12 = vcmask 258048  }
 0x7fa   : > { %v3819_v13 = vpop.eup %3818  ;;  %3826 = vrsqrt.f32 %v2498_v0  ;;  %vm2529_vm6 = vcmp.eq.f32.partialorder %v2498_v0, inf  ;;  %v2532_v17 = vand.u32 2147483648, %v2498_v0  ;;  %vm2531_vm7 = vcmp.eq.f32.partialorder %v2498_v0, 0.0 }
 0x7fb   : > { %v3821_v1 = vpop.eup %3820  ;;  %v2507_v3 = vmul.f32 %v3819_v13, %v2477_v63 }
 0x7fc   : > { %v2500_v4 = vmul.f32 %v3821_v1, %v2470_v31 }
 0x7fd   : > { %v3823_v7 = vpop.eup %3822  ;;  %v2509_v38 = vsel %vm2508_vm14, %v2477_v63, %v2507_v3 }
 0x7fe   : > { %v2502_v14 = vsel %vm2501_vm15, %v2470_v31, %v2500_v4  ;;  %v2512_v15 = vsel %vm2510_vm0, %v2511_v6, %v2509_v38  ;;  %v2514_v45 = vmul.f32 %v3823_v7, %v2484_v62 }
 0x7ff   : > { %v2505_v40 = vsel %vm2503_vm1, %v2504_v37, %v2502_v14  ;;  %v2541_v16 = vadd.f32 0.2, %v2512_v15 }
 0x800   : > { %3828 = vrsqrt.f32 %v2505_v40  ;;  %v2516_v41 = vsel %vm2515_vm2, %v2484_v62, %v2514_v45  ;;  %vm2536_vm8 = vcmp.eq.f32.partialorder %v2505_v40, inf  ;;  %v2539_v24 = vand.u32 2147483648, %v2505_v40 }
 0x801   : > { %3830 = vrcp.f32 %v2541_v16  ;;  %v2519_v20 = vsel %vm2517_vm3, %v2518_v19, %v2516_v41  ;;  %vm2538_vm9 = vcmp.eq.f32.partialorder %v2505_v40, 0.0 }
 0x802   : > { %v3825_v22 = vpop.eup %3824  ;;  %v2542_v43 = vadd.f32 0.2, %v2519_v20 }
 0x803   : > { %v2521_v44 = vmul.f32 %v3825_v22, %v2491_v36 }
 0x804   : > { %3832 = vrcp.f32 %v2542_v43  ;;  %v3827_v25 = vpop.eup %3826 }
 0x805   : > { %v2523_v27 = vsel %vm2522_vm4, %v2491_v36, %v2521_v44  ;;  %v2528_v32 = vmul.f32 %v3827_v25, %v2498_v0 }
 0x806   : > { %v2526_v29 = vsel %vm2524_vm5, %v2525_v23, %v2523_v27 }
 0x807   : > { %v2543_v34 = vadd.f32 0.2, %v2526_v29  ;;  %v2530_v48 = vsel %vm2529_vm6, %v2498_v0, %v2528_v32 }
 0x808   : > { %v2533_v50 = vsel %vm2531_vm7, %v2532_v17, %v2530_v48 }
 0x809   : > { %3834 = vrcp.f32 %v2543_v34  ;;  %v2544_v52 = vadd.f32 0.2, %v2533_v50 }
 0x80a   : > { %v3829_v51 = vpop.eup %3828 }
 0x80b   : > { %v3831_v54 = vpop.eup %3830  ;;  %v2535_v55 = vmul.f32 %v3829_v51, %v2505_v40  ;;  %3836 = vrcp.f32 %v2544_v52 }
 0x80c   : > { %v2547_v26 = vmul.f32 %v3831_v54, %v4345_v49 }
 0x80d   : > { %v2537_v39 = vsel %vm2536_vm8, %v2505_v40, %v2535_v55 }
 0x80e   : > { %v3833_v2 = vpop.eup %3832  ;;  %2561 = vrot.lane.b32.xlu0 %v2547_v26, %s3907_s8  ;;  %v2540_v57 = vsel %vm2538_vm9, %v2539_v24, %v2537_v39 }
 0x80f   : > { %v2545_v42 = vadd.f32 0.2, %v2540_v57  ;;  %v2549_v5 = vmul.f32 %v3833_v2, %v4342_v47 }
 0x811   : > { %3838 = vrcp.f32 %v2545_v42 }
 0x812   : > { %2563 = vrot.lane.b32.xlu0 %v2549_v5, %s3907_s8 }
 0x813   : > { %v3835_v58 = vpop.eup %3834 }
 0x814   : > { %v2551_v59 = vmul.f32 %v3835_v58, %v4355_v56 }
 0x815   : > { %v3837_v9 = vpop.eup %3836 }
 0x816   : > { %2565 = vrot.lane.b32.xlu1 %v2551_v59, %s3907_s8  ;;  %v2553_v49 = vmul.f32 %v3837_v9, %v4352_v53 }
 0x81a   : > { %2567 = vrot.lane.b32.xlu1 %v2553_v49, %s3907_s8 }
 0x81b   : > { %v3839_v33 = vpop.eup %3838 }
 0x81c   : > { %v2555_v63 = vmul.f32 %v3839_v33, %v4365_v28 }
 0x81e   : > { %2569 = vrot.lane.b32.xlu0 %v2555_v63, %s3907_s8 }
 0x880   : > { %v2562_v12 = vpop.permute.xlu0 %2561 }
 0x881   : > { %2577 = vst.msk [vmem:[%s190_s11 - $0x5] sm:$0xe0] %vm2576_vm10, %v2562_v12 }
 0x884   : > { %v2564_v47 = vpop.permute.xlu0 %2563 }
 0x885   : > { %2579 = vst.msk [vmem:[%s190_s11 + $0x3] sm:$0xff] %vm2578_vm11, %v2564_v47 }
 0x888   : > { %v2566_v56 = vpop.permute.xlu1 %2565 }
 0x889   : > { %2580 = vst.msk [vmem:[%s190_s11 + $0xb] sm:$0xff] %vm2578_vm11, %v2566_v56 }
 0x88c   : > { %v2568_v53 = vpop.permute.xlu1 %2567 }
 0x88d   : > { %2581 = vst.msk [vmem:[%s190_s11 + $0x13] sm:$0xff] %vm2578_vm11, %v2568_v53 }
 0x890   : > { %v2570_v28 = vpop.permute.xlu0 %2569 }
 0x891   : > { %2583 = vst.msk [vmem:[%s190_s11 + $0x1b] sm:$0x1f] %vm2582_vm12, %v2570_v28 }
 0x892   : > { %3853 = shalt.err (!%p3850_p3)
}
 0x893   : > { %s3854_s30 = scalar_lea.hbm %s4614_s22, 512  ;;  %s3858_s7 = scalar_lea.hbm %s4661_s4, 1024 }
 0x894   : > { %p3855_p4 = scmp.ne.s32.totalorder %s4614_s22, %s3854_s30  ;;  %p3859_p9 = scmp.lt.u32.totalorder %s4614_s22, %s4661_s4 }
 0x895   : > { %p3860_p10 = scmp.lt.u32.totalorder %s3858_s7, %s3854_s30  ;;  %p3862_p12 = scmp.lt.u32.totalorder %s3854_s30, %s4614_s22 }
 0x896   : > { %p3856_p7 = pnand %p3855_p4, %p3974_p5 }
 0x897   : > { %p3861_p11 = por %p3860_p10, %p3859_p9 }
 0x898   : > { %p3857_p8 = pneg %p3856_p7 }
 0x899   : > { %p3863_p13 = por %p3862_p12, %p3861_p11 }
 0x89b   : > { %p3864_p0 = pnand %p3863_p13, %p3857_p8 }
 0x89d   : > { %3867 = shalt.err (!%p3864_p0)
}
 0x89e   : > { %s3909_s10 = smov 128   ;;  %s3910_s11 = smov 8  }
 0x89f   : > { %3753 = dma.vmem_to_hbm [thread:$0]  (%p3974_p5), %s4609_s12, 512, %s4614_s22, %s4616_s23, %s3909_s10, %s3909_s10, %s3910_s11  }
 0x8a0 PF: > { %p3759_p1 = scmp.ge.s32.totalorder %s3902_s18, 2  ;;  %s2613_s13 = sand.u32 1, %s3890_s15  }
 0x8a1   : > { %s2614_s14 = scalar_lea.sflag [#allocation3], %s2613_s13 }
 0x8a2   : > { %p3756_p2 = pnand %p3759_p1, %p3978_p6 }
 0x8a4   : > { %3885 = dma.done.wait (!%p3756_p2), %s2614_s14, 512  }
 0x8a5   : > { %3887 = vsyncadd (!%p3756_p2), %s2614_s14, 4294966784  ;;  %p14_p3 = scmp.ge.s32.totalorder %s3961_s21, 4   ;;  %s4666_s15 = smov %s3894_s16 }
 0x8a6   : > { %s4667_s16 = smov %s3898_s17  ;;  %s4668_s17 = smov %s3972_s24 }
 0x8a7   : > { %s4669_s18 = smov %s3961_s21  ;;  %16 = sbr.rel (!%p14_p3) target bundleno = 3 (0x3), region = 71 }
 0x8ae   :  { %2619 = vsyncpa [#allocation3], 1 }
 0x8af   :  { %2621 = vsyncpa [#allocation3 + $0x1], 1 }

</bundles_post_ra>
